<compile_context>
chip_gen: v5e
topology: v5e:2x2
jax: 0.10.0
libtpu: 0.0.40
codegen_flags: <defaults>
</compile_context>

<pallas_src>
import jax
import jax.numpy as jnp
from jax.experimental import pallas as pl
from jax.experimental.pallas import tpu as pltpu

INPUT_DIM = 768
HIDDEN_DIM = 512
HIDDEN2_DIM = HIDDEN_DIM // 2      # 256
OUTPUT_DIM = 2
OUT_PAD = 128                      # lane-dense padded output width


def mlp_kernel(x_ref, w1_ref, b1_ref, w2_ref, b2_ref, w3_ref, b3_ref, o_ref):
    # fc1: bf16 MXU matmul, f32 accumulation; bias add + ReLU stay in f32 (VPU).
    h1 = jnp.dot(x_ref[...], w1_ref[...], preferred_element_type=jnp.float32)
    h1 = jnp.maximum(h1 + b1_ref[...], 0.0)
    # TODO(synk): nn.Dropout(0.2) is identity in eval mode; training-mode mask not implemented.
    # fc2: cast activations down to bf16 only for the next MXU op.
    h2 = jnp.dot(h1.astype(jnp.bfloat16), w2_ref[...],
                 preferred_element_type=jnp.float32)
    h2 = jnp.maximum(h2 + b2_ref[...], 0.0)
    # fc3: output padded to 128 lanes -> unmasked, lane-dense store.
    out = jnp.dot(h2.astype(jnp.bfloat16), w3_ref[...],
                  preferred_element_type=jnp.float32)
    o_ref[...] = (out + b3_ref[...]).astype(o_ref.dtype)


def _round_up(n, m):
    return ((n + m - 1) // m) * m


def performance_predictor(x, params, *, block_b=512):
    """x: (B, INPUT_DIM) float32. params: f32 dict of w1,b1,w2,b2,w3,b3.

    Weights are stored as (in_features, out_features) (transpose of PyTorch's
    nn.Linear weight). Returns (B, OUTPUT_DIM) float32.
    """
    B, D = x.shape
    assert D == INPUT_DIM

    # --- batch tiling -------------------------------------------------------
    # Large tiles fill the MXU M dimension; clamp to the (sublane-rounded)
    # batch for tiny inputs.
    bb = min(block_b, _round_up(B, 8))
    # Keep >= 2 grid steps for large batches so the "parallel" batch axis can
    # shard across both TensorCores on v7x, while keeping the tile a multiple
    # of 256 (v6e/v7x MXU M width).
    if B >= 512 and _round_up(B, bb) // bb < 2:
        bb = max(256, bb // 2)
    Bp = _round_up(B, bb)

    # --- dtype / padding plumbing (all wrapper-side, outside the kernel) -----
    xb = x.astype(jnp.bfloat16)
    if Bp != B:
        xb = jnp.pad(xb, ((0, Bp - B), (0, 0)))

    w1 = params["w1"].astype(jnp.bfloat16)
    w2 = params["w2"].astype(jnp.bfloat16)
    w3 = params["w3"].astype(jnp.bfloat16)
    b1 = params["b1"].astype(jnp.float32)
    b2 = params["b2"].astype(jnp.float32)
    b3 = params["b3"].astype(jnp.float32)

    # Zero-pad fc3 to a 128-wide output; the extra columns are zero and are
    # sliced off below.
    w3p = jnp.zeros((HIDDEN2_DIM, OUT_PAD), jnp.bfloat16).at[:, :OUTPUT_DIM].set(w3)
    b3p = jnp.zeros((1, OUT_PAD), jnp.float32).at[:, :OUTPUT_DIM].set(b3)

    grid = (Bp // bb,)

    in_specs = [
        pl.BlockSpec((bb, INPUT_DIM), lambda i: (i, 0)),             # x tile
        pl.BlockSpec((INPUT_DIM, HIDDEN_DIM), lambda i: (0, 0)),     # w1
        pl.BlockSpec((1, HIDDEN_DIM), lambda i: (0, 0)),             # b1
        pl.BlockSpec((HIDDEN_DIM, HIDDEN2_DIM), lambda i: (0, 0)),   # w2
        pl.BlockSpec((1, HIDDEN2_DIM), lambda i: (0, 0)),            # b2
        pl.BlockSpec((HIDDEN2_DIM, OUT_PAD), lambda i: (0, 0)),      # w3 (padded)
        pl.BlockSpec((1, OUT_PAD), lambda i: (0, 0)),                # b3 (padded)
    ]
    out_specs = pl.BlockSpec((bb, OUT_PAD), lambda i: (i, 0))

    out_padded = pl.pallas_call(
        mlp_kernel,
        out_shape=jax.ShapeDtypeStruct((Bp, OUT_PAD), jnp.float32),
        grid_spec=pl.GridSpec(
            grid=grid,
            in_specs=in_specs,
            out_specs=out_specs,
        ),
        compiler_params=pltpu.CompilerParams(
            dimension_semantics=("parallel",),
        ),
    )(xb, w1, b1, w2, b2, w3p, b3p)

    return out_padded[:B, :OUTPUT_DIM]


def init_params(key):
    """Deterministic parameter init matching nn.Linear shapes (stored transposed)."""
    k1, k2, k3, k4, k5, k6 = jax.random.split(key, 6)

    def linear_init(kw, kb, fan_in, fan_out):
        bound = 1.0 / jnp.sqrt(fan_in)
        w = jax.random.uniform(kw, (fan_in, fan_out), jnp.float32, -bound, bound)
        b = jax.random.uniform(kb, (1, fan_out), jnp.float32, -bound, bound)
        return w, b

    w1, b1 = linear_init(k1, k2, INPUT_DIM, HIDDEN_DIM)
    w2, b2 = linear_init(k3, k4, HIDDEN_DIM, HIDDEN2_DIM)
    w3, b3 = linear_init(k5, k6, HIDDEN2_DIM, OUTPUT_DIM)
    return {"w1": w1, "b1": b1, "w2": w2, "b2": b2, "w3": w3, "b3": b3}


def reference_forward(x, p):
    h1 = jnp.maximum(x @ p["w1"] + p["b1"], 0.0)
    h2 = jnp.maximum(h1 @ p["w2"] + p["b2"], 0.0)
    return h2 @ p["w3"] + p["b3"]


if __name__ == "__main__":
    key = jax.random.PRNGKey(0)
    kx, kp = jax.random.split(key)
    params = init_params(kp)

    # Small batch (single grid step, tile clamped to batch).
    B = 8
    x = jax.random.normal(kx, (B, INPUT_DIM), jnp.float32)
    out = jax.block_until_ready(performance_predictor(x, params))
    ref = reference_forward(x, params)
    assert out.shape == (B, OUTPUT_DIM)
    # bf16 matmuls with f32 accumulation -> loosen tolerance vs f32 reference.
    assert jnp.allclose(out, ref, atol=5e-2, rtol=5e-2), "mismatch vs reference (B=8)"

    # Non-multiple batch exercises the padding path and a multi-step grid.
    B2 = 300
    x2 = jax.random.normal(jax.random.PRNGKey(1), (B2, INPUT_DIM), jnp.float32)
    out2 = jax.block_until_ready(performance_predictor(x2, params, block_b=128))
    ref2 = reference_forward(x2, params)
    assert out2.shape == (B2, OUTPUT_DIM)
    assert jnp.allclose(out2, ref2, atol=5e-2, rtol=5e-2), "mismatch vs reference (B=300)"

    print("KERNEL_OK")
</pallas_src>

<mosaic_0001>
module attributes {stable_mosaic.version = 11 : i64} {
  func.func @mlp_kernel(%arg0: i32, %arg1: memref<8x768xbf16, #tpu.memory_space<vmem>>, %arg2: memref<768x512xbf16, #tpu.memory_space<vmem>>, %arg3: memref<1x512xf32, #tpu.memory_space<vmem>>, %arg4: memref<512x256xbf16, #tpu.memory_space<vmem>>, %arg5: memref<1x256xf32, #tpu.memory_space<vmem>>, %arg6: memref<256x128xbf16, #tpu.memory_space<vmem>>, %arg7: memref<1x128xf32, #tpu.memory_space<vmem>>, %arg8: memref<8x128xf32, #tpu.memory_space<vmem>>) attributes {dimension_semantics = [#tpu.dimension_semantics<parallel>], iteration_bounds = array<i64: 1>, scalar_prefetch = 0 : i64, scratch_operands = 0 : i64, tpu.core_type = #tpu.core_type<tc>, window_params = [{transform_indices = @transform_0, window_bounds = array<i64: 8, 768>}, {pipeline_mode = #tpu.pipeline_mode<synchronous>, transform_indices = @transform_1, window_bounds = array<i64: 768, 512>}, {pipeline_mode = #tpu.pipeline_mode<synchronous>, transform_indices = @transform_2, window_bounds = array<i64: 1, 512>}, {pipeline_mode = #tpu.pipeline_mode<synchronous>, transform_indices = @transform_3, window_bounds = array<i64: 512, 256>}, {pipeline_mode = #tpu.pipeline_mode<synchronous>, transform_indices = @transform_4, window_bounds = array<i64: 1, 256>}, {pipeline_mode = #tpu.pipeline_mode<synchronous>, transform_indices = @transform_5, window_bounds = array<i64: 256, 128>}, {pipeline_mode = #tpu.pipeline_mode<synchronous>, transform_indices = @transform_6, window_bounds = array<i64: 1, 128>}, {transform_indices = @transform_7, window_bounds = array<i64: 8, 128>}]} {
    %c0 = arith.constant 0 : index
    %c0_0 = arith.constant 0 : index
    %0 = vector.load %arg1[%c0, %c0_0] : memref<8x768xbf16, #tpu.memory_space<vmem>>, vector<8x768xbf16>
    %c0_1 = arith.constant 0 : index
    %c0_2 = arith.constant 0 : index
    %1 = vector.load %arg2[%c0_1, %c0_2] : memref<768x512xbf16, #tpu.memory_space<vmem>>, vector<768x512xbf16>
    %cst = arith.constant dense<0.000000e+00> : vector<8x512xf32>
    %2 = tpu.matmul %0, %1, %cst {dimension_numbers = #tpu.dot_dimension_numbers<[1], [0], [0], [1], [0, 0, 1, 1], [], []>} : vector<8x768xbf16>, vector<768x512xbf16>, vector<8x512xf32> -> vector<8x512xf32>
    %c0_3 = arith.constant 0 : index
    %c0_4 = arith.constant 0 : index
    %3 = vector.load %arg3[%c0_3, %c0_4] : memref<1x512xf32, #tpu.memory_space<vmem>>, vector<1x512xf32>
    %4 = vector.broadcast %3 : vector<1x512xf32> to vector<8x512xf32>
    %5 = arith.addf %2, %4 : vector<8x512xf32>
    %cst_5 = arith.constant 0.000000e+00 : f32
    %6 = vector.broadcast %cst_5 : f32 to vector<8x512xf32>
    %7 = arith.maximumf %5, %6 : vector<8x512xf32>
    %8 = arith.truncf %7 : vector<8x512xf32> to vector<8x512xbf16>
    %c0_6 = arith.constant 0 : index
    %c0_7 = arith.constant 0 : index
    %9 = vector.load %arg4[%c0_6, %c0_7] : memref<512x256xbf16, #tpu.memory_space<vmem>>, vector<512x256xbf16>
    %cst_8 = arith.constant dense<0.000000e+00> : vector<8x256xf32>
    %10 = tpu.matmul %8, %9, %cst_8 {dimension_numbers = #tpu.dot_dimension_numbers<[1], [0], [0], [1], [0, 0, 1, 1], [], []>} : vector<8x512xbf16>, vector<512x256xbf16>, vector<8x256xf32> -> vector<8x256xf32>
    %c0_9 = arith.constant 0 : index
    %c0_10 = arith.constant 0 : index
    %11 = vector.load %arg5[%c0_9, %c0_10] : memref<1x256xf32, #tpu.memory_space<vmem>>, vector<1x256xf32>
    %12 = vector.broadcast %11 : vector<1x256xf32> to vector<8x256xf32>
    %13 = arith.addf %10, %12 : vector<8x256xf32>
    %cst_11 = arith.constant 0.000000e+00 : f32
    %14 = vector.broadcast %cst_11 : f32 to vector<8x256xf32>
    %15 = arith.maximumf %13, %14 : vector<8x256xf32>
    %16 = arith.truncf %15 : vector<8x256xf32> to vector<8x256xbf16>
    %c0_12 = arith.constant 0 : index
    %c0_13 = arith.constant 0 : index
    %17 = vector.load %arg6[%c0_12, %c0_13] : memref<256x128xbf16, #tpu.memory_space<vmem>>, vector<256x128xbf16>
    %cst_14 = arith.constant dense<0.000000e+00> : vector<8x128xf32>
    %18 = tpu.matmul %16, %17, %cst_14 {dimension_numbers = #tpu.dot_dimension_numbers<[1], [0], [0], [1], [0, 0, 1, 1], [], []>} : vector<8x256xbf16>, vector<256x128xbf16>, vector<8x128xf32> -> vector<8x128xf32>
    %c0_15 = arith.constant 0 : index
    %c0_16 = arith.constant 0 : index
    %19 = vector.load %arg7[%c0_15, %c0_16] : memref<1x128xf32, #tpu.memory_space<vmem>>, vector<1x128xf32>
    %20 = vector.broadcast %19 : vector<1x128xf32> to vector<8x128xf32>
    %21 = arith.addf %18, %20 : vector<8x128xf32>
    %c0_17 = arith.constant 0 : index
    %c0_18 = arith.constant 0 : index
    %22 = vector.load %arg8[%c0_17, %c0_18] : memref<8x128xf32, #tpu.memory_space<vmem>>, vector<8x128xf32>
    tpu.vector_store %arg8[%c0_17, %c0_18], %21 {strides = array<i32>} : memref<8x128xf32, #tpu.memory_space<vmem>>, vector<8x128xf32>,
    return
  }
  func.func @transform_0(%arg0: i32) -> (i32, i32) {
    %c0_i32 = arith.constant 0 : i32
    %c0_i32_0 = arith.constant 0 : i32
    return %arg0, %c0_i32 : i32, i32
  }
  func.func @transform_1(%arg0: i32) -> (i32, i32) {
    %c0_i32 = arith.constant 0 : i32
    %c0_i32_0 = arith.constant 0 : i32
    %c0_i32_1 = arith.constant 0 : i32
    return %c0_i32, %c0_i32_0 : i32, i32
  }
  func.func @transform_2(%arg0: i32) -> (i32, i32) {
    %c0_i32 = arith.constant 0 : i32
    %c0_i32_0 = arith.constant 0 : i32
    %c0_i32_1 = arith.constant 0 : i32
    return %c0_i32, %c0_i32_0 : i32, i32
  }
  func.func @transform_3(%arg0: i32) -> (i32, i32) {
    %c0_i32 = arith.constant 0 : i32
    %c0_i32_0 = arith.constant 0 : i32
    %c0_i32_1 = arith.constant 0 : i32
    return %c0_i32, %c0_i32_0 : i32, i32
  }
  func.func @transform_4(%arg0: i32) -> (i32, i32) {
    %c0_i32 = arith.constant 0 : i32
    %c0_i32_0 = arith.constant 0 : i32
    %c0_i32_1 = arith.constant 0 : i32
    return %c0_i32, %c0_i32_0 : i32, i32
  }
  func.func @transform_5(%arg0: i32) -> (i32, i32) {
    %c0_i32 = arith.constant 0 : i32
    %c0_i32_0 = arith.constant 0 : i32
    %c0_i32_1 = arith.constant 0 : i32
    return %c0_i32, %c0_i32_0 : i32, i32
  }
  func.func @transform_6(%arg0: i32) -> (i32, i32) {
    %c0_i32 = arith.constant 0 : i32
    %c0_i32_0 = arith.constant 0 : i32
    %c0_i32_1 = arith.constant 0 : i32
    return %c0_i32, %c0_i32_0 : i32, i32
  }
  func.func @transform_7(%arg0: i32) -> (i32, i32) {
    %c0_i32 = arith.constant 0 : i32
    %c0_i32_0 = arith.constant 0 : i32
    return %arg0, %c0_i32 : i32, i32
  }
}

</mosaic_0001>

<bundles_post_ra>
// kernel: tpu_custom_call.1
= control target key start
LH: loop header
LB: loop body
LE: loop exit
PB: predicated region body
PF: predicated region fallthrough
CT: control target
= control target key end

     0   :  { %12 = vsyncpa [#allocation3], 0  ;;  %s3942_s0 = inlined_call_operand.hbm [shape: bf16[8,768], index: 0, kind: input, shape index: {}]   ;;  %s3943_s1 = inlined_call_operand.hbm [shape: bf16[768,512], index: 1, kind: input, shape index: {}]   ;;  %s3944_s2 = inlined_call_operand.hbm [shape: f32[1,512], index: 2, kind: input, shape index: {}]   ;;  %s3945_s3 = inlined_call_operand.hbm [shape: bf16[512,256], index: 3, kind: input, shape index: {}]   ;;  %s3946_s4 = inlined_call_operand.vmem [shape: f32[1,256], index: 4, kind: input, shape index: {}]   ;;  %s3947_s5 = inlined_call_operand.hbm [shape: bf16[256,128], index: 5, kind: input, shape index: {}]   ;;  %s3948_s6 = inlined_call_operand.vmem [shape: f32[1,128], index: 6, kind: input, shape index: {}]   ;;  %s3949_s7 = inlined_call_operand.hbm [shape: f32[8,128], index: 7, kind: output, shape index: {}]  }
   0x1   :  { %13 = vsyncpa [#allocation6], 0 }
   0x2   :  { %14 = vsyncpa [#allocation9], 0  ;;  %s31_s26 = sshll.u32 %s3943_s1, 4  ;;  %s32_s26 = int_to_ptr.hbm [resolvable:$true] %s31_s26 }
   0x3   :  { %15 = vsyncpa [#allocation4], 0  ;;  %s3808_s27 = smov [#allocation5]   ;;  %s55_s8 = sshll.u32 %s3945_s3, 4  ;;  %s56_s8 = int_to_ptr.hbm [resolvable:$true] %s55_s8 }
   0x4   :  { %s33_s28 = sshll.u32 %s3808_s27, 4  ;;  %s3809_s9 = smov 256   ;;  %s34_s28 = int_to_ptr.vmem [resolvable:$true] %s33_s28 }
   0x5   :  { %s3810_s10 = smov 16   ;;  %s3811_s11 = smov [#allocation8]  }
   0x6   :  { %39 = dma.hbm_to_vmem [thread:$0]  %s32_s26, 24576, %s34_s28, [#allocation6], %s3809_s9, %s3809_s9, %s3810_s10  }
   0x7   :  { %s57_s12 = sshll.u32 %s3811_s11, 4  ;;  %s3812_s13 = smov 128   ;;  %s58_s12 = int_to_ptr.vmem [resolvable:$true] %s57_s12 }
   0x8   :  { %s3813_s14 = smov 8   ;;  %s21_s16 = sshll.u32 %s3942_s0, 4  ;;  %s22_s16 = int_to_ptr.hbm [resolvable:$true] %s21_s16 }
   0x9   :  { %63 = dma.hbm_to_vmem [thread:$0]  %s56_s8, 8192, %s58_s12, [#allocation9], %s3812_s13, %s3812_s13, %s3813_s14  }
   0xa   :  { %s3814_s17 = smov [#allocation2]   ;;  %s45_s20 = sshll.u32 %s3944_s2, 4  ;;  %s46_s20 = int_to_ptr.hbm [resolvable:$true] %s45_s20 }
   0xb   :  { %s23_s18 = sshll.u32 %s3814_s17, 4  ;;  %s3815_s21 = smov [#allocation7]   ;;  %s24_s18 = int_to_ptr.vmem [resolvable:$true] %s23_s18 }
   0xc   :  { %26 = dma.hbm_to_vmem [thread:$0]  %s22_s16, 384, %s24_s18, [#allocation3]  }
   0xd   :  { %s47_s22 = sshll.u32 %s3815_s21, 4  ;;  %s70_s25 = sshll.u32 %s3947_s5, 4  ;;  %s48_s22 = int_to_ptr.vmem [resolvable:$true] %s47_s22  ;;  %s71_s25 = int_to_ptr.hbm [resolvable:$true] %s70_s25 }
   0xe   :  { %50 = dma.hbm_to_vmem [thread:$0]  %s46_s20, 64, %s48_s22, [#allocation6]  }
   0xf   :  { %s3816_s0 = smov [#allocation10]   ;;  %s3817_s27 = smov 64  }
  0x10   :  { %s72_s26 = sshll.u32 %s3816_s0, 4  ;;  %s3818_s28 = smov 4   ;;  %s73_s26 = int_to_ptr.vmem [resolvable:$true] %s72_s26 }
  0x11   :  { %78 = dma.hbm_to_vmem [thread:$0]  %s71_s25, 2048, %s73_s26, [#allocation9], %s3817_s27, %s3817_s27, %s3818_s28  }
  0x12   :  { %3800 = dma.done.wait [#allocation3], 384  }
  0x13   :  { %3801 = vsyncadd [#allocation3], 4294966912 }
  0x14   :  { %3802 = dma.done.wait [#allocation6], 24640  }
  0x15   :  { %3803 = vsyncadd [#allocation6], 4294942656 }
  0x16   :  { %3804 = dma.done.wait [#allocation9], 10240  }
  0x17   :  { %3805 = vsyncadd [#allocation9], 4294957056  ;;  %v2397_v0 = vld [vmem:[#allocation5 + $0xe0] sm:$0xf]  ;;  %v3401_v1 = vld [vmem:[#allocation5 + $0xec] sm:$0xf0] }
  0x18   :  { %v2525_v2 = vld [vmem:[#allocation5 + $0x1e0] sm:$0xf]  ;;  %v2398_v3 = vor.u32 %v3401_v1, %v2397_v0  ;;  %v3433_v4 = vld [vmem:[#allocation5 + $0x1ec] sm:$0xf0]  ;;  %s3819_s30 = smov [#allocation11]   ;;  %s2271_s11 = sshll.u32 %s3949_s7, 4  ;;  %s2272_s11 = int_to_ptr.hbm [resolvable:$true] %s2271_s11 }
  0x19   :  { %v2653_v5 = vld [vmem:[#allocation5 + $0x2e0] sm:$0xf]  ;;  %v3465_v6 = vld [vmem:[#allocation5 + $0x2ec] sm:$0xf0]  ;;  %v2526_v7 = vor.u32 %v3433_v4, %v2525_v2  ;;  %s2269_s8 = sshll.u32 %s3819_s30, 4  ;;  %s2270_s8 = int_to_ptr.vmem [resolvable:$true] %s2269_s8 }
  0x1a   :  { %v2654_v8 = vor.u32 %v3465_v6, %v2653_v5  ;;  %v2781_v9 = vld [vmem:[#allocation5 + $0x3e0] sm:$0xf]  ;;  %v3497_v10 = vld [vmem:[#allocation5 + $0x3ec] sm:$0xf0]  ;;  %1287 = vmatpush.bf16.msra.mxu0 %v2398_v3 }
  0x1b   :  { %v2381_v11 = vld [vmem:[#allocation5 + $0xc0] sm:$0xf]  ;;  %v2782_v12 = vor.u32 %v3497_v10, %v2781_v9  ;;  %v3397_v13 = vld [vmem:[#allocation5 + $0xcc] sm:$0xf0]  ;;  %1300 = vmatpush.bf16.msra.mxu1 %v2526_v7 }
  0x1c   :  { %v2509_v14 = vld [vmem:[#allocation5 + $0x1c0] sm:$0xf]  ;;  %v3429_v15 = vld [vmem:[#allocation5 + $0x1cc] sm:$0xf0]  ;;  %1313 = vmatpush.bf16.msra.mxu2 %v2654_v8  ;;  %v2382_v16 = vor.u32 %v3397_v13, %v2381_v11 }
  0x1d   :  { %v2510_v17 = vor.u32 %v3429_v15, %v2509_v14  ;;  %v2637_v18 = vld [vmem:[#allocation5 + $0x2c0] sm:$0xf]  ;;  %v3461_v19 = vld [vmem:[#allocation5 + $0x2cc] sm:$0xf0]  ;;  %1326 = vmatpush.bf16.msra.mxu3 %v2782_v12 }
  0x1e   :  { %v2765_v20 = vld [vmem:[#allocation5 + $0x3c0] sm:$0xf]  ;;  %v2638_v21 = vor.u32 %v3461_v19, %v2637_v18  ;;  %v3493_v22 = vld [vmem:[#allocation5 + $0x3cc] sm:$0xf0]  ;;  %1288 = vmatpush.bf16.msra.mxu0 %v2382_v16 }
  0x1f   :  { %v2365_v23 = vld [vmem:[#allocation5 + $0xa0] sm:$0xf]  ;;  %v3393_v24 = vld [vmem:[#allocation5 + $0xac] sm:$0xf0]  ;;  %v2766_v25 = vor.u32 %v3493_v22, %v2765_v20  ;;  %1301 = vmatpush.bf16.msra.mxu1 %v2510_v17 }
  0x20   :  { %v2493_v26 = vld [vmem:[#allocation5 + $0x1a0] sm:$0xf]  ;;  %v3425_v27 = vld [vmem:[#allocation5 + $0x1ac] sm:$0xf0]  ;;  %v2366_v29 = vor.u32 %v3393_v24, %v2365_v23  ;;  %1314 = vmatpush.bf16.msra.mxu2 %v2638_v21 }
  0x21   :  { %v2621_v28 = vld [vmem:[#allocation5 + $0x2a0] sm:$0xf]  ;;  %v3457_v30 = vld [vmem:[#allocation5 + $0x2ac] sm:$0xf0]  ;;  %v2494_v33 = vor.u32 %v3425_v27, %v2493_v26  ;;  %1327 = vmatpush.bf16.msra.mxu3 %v2766_v25 }
  0x22   :  { %v2749_v31 = vld [vmem:[#allocation5 + $0x3a0] sm:$0xf]  ;;  %v3489_v32 = vld [vmem:[#allocation5 + $0x3ac] sm:$0xf0]  ;;  %v2622_v34 = vor.u32 %v3457_v30, %v2621_v28  ;;  %1289 = vmatpush.bf16.msra.mxu0 %v2366_v29 }
  0x23   :  { %v2349_v35 = vld [vmem:[#allocation5 + $0x80] sm:$0xf]  ;;  %v3389_v36 = vld [vmem:[#allocation5 + $0x8c] sm:$0xf0]  ;;  %v2750_v38 = vor.u32 %v3489_v32, %v2749_v31  ;;  %1302 = vmatpush.bf16.msra.mxu1 %v2494_v33  ;;  %v3399_v33 = vld [vmem:[#allocation5 + $0xe4] sm:$0xf] }
  0x24   :  { %v2477_v37 = vld [vmem:[#allocation5 + $0x180] sm:$0xf]  ;;  %v3421_v39 = vld [vmem:[#allocation5 + $0x18c] sm:$0xf0]  ;;  %v2350_v44 = vor.u32 %v3389_v36, %v2349_v35  ;;  %1315 = vmatpush.bf16.msra.mxu2 %v2622_v34  ;;  %v2399_v34 = vld [vmem:[#allocation5 + $0xf0] sm:$0xf0] }
  0x25   :  { %v2605_v40 = vld [vmem:[#allocation5 + $0x280] sm:$0xf]  ;;  %v3453_v41 = vld [vmem:[#allocation5 + $0x28c] sm:$0xf0]  ;;  %v2478_v45 = vor.u32 %v3421_v39, %v2477_v37  ;;  %1328 = vmatpush.bf16.msra.mxu3 %v2750_v38  ;;  %v3431_v37 = vld [vmem:[#allocation5 + $0x1e4] sm:$0xf] }
  0x26   :  { %v2733_v42 = vld [vmem:[#allocation5 + $0x380] sm:$0xf]  ;;  %v3485_v43 = vld [vmem:[#allocation5 + $0x38c] sm:$0xf0]  ;;  %v2606_v46 = vor.u32 %v3453_v41, %v2605_v40  ;;  %1290 = vmatpush.bf16.msra.mxu0 %v2350_v44  ;;  %v2527_v38 = vld [vmem:[#allocation5 + $0x1f0] sm:$0xf0] }
  0x27   :  { %v2333_v47 = vld [vmem:[#allocation5 + $0x60] sm:$0xf]  ;;  %v3385_v48 = vld [vmem:[#allocation5 + $0x6c] sm:$0xf0]  ;;  %v2734_v50 = vor.u32 %v3485_v43, %v2733_v42  ;;  %1303 = vmatpush.bf16.msra.mxu1 %v2478_v45  ;;  %v2402_v42 = vor.u32 %v3399_v33, %v2399_v34  ;;  %v2463_v33 = vld [vmem:[#allocation5 + $0x170] sm:$0xf0] }
  0x28   :  { %v2461_v49 = vld [vmem:[#allocation5 + $0x160] sm:$0xf]  ;;  %v3417_v51 = vld [vmem:[#allocation5 + $0x16c] sm:$0xf0]  ;;  %v2334_v56 = vor.u32 %v3385_v48, %v2333_v47  ;;  %1316 = vmatpush.bf16.msra.mxu2 %v2606_v46  ;;  %v2530_v46 = vor.u32 %v3431_v37, %v2527_v38  ;;  %v3395_v48 = vld [vmem:[#allocation5 + $0xc4] sm:$0xf] }
  0x29   :  { %v2589_v52 = vld [vmem:[#allocation5 + $0x260] sm:$0xf]  ;;  %v3449_v53 = vld [vmem:[#allocation5 + $0x26c] sm:$0xf0]  ;;  %v2462_v57 = vor.u32 %v3417_v51, %v2461_v49  ;;  %1329 = vmatpush.bf16.msra.mxu3 %v2734_v50  ;;  %v2383_v49 = vld [vmem:[#allocation5 + $0xd0] sm:$0xf0] }
  0x2a   :  { %v2717_v54 = vld [vmem:[#allocation5 + $0x360] sm:$0xf]  ;;  %v3481_v55 = vld [vmem:[#allocation5 + $0x36c] sm:$0xf0]  ;;  %v2590_v58 = vor.u32 %v3449_v53, %v2589_v52  ;;  %1291 = vmatpush.bf16.msra.mxu0 %v2334_v56  ;;  %v3427_v50 = vld [vmem:[#allocation5 + $0x1c4] sm:$0xf] }
  0x2b   :  { %v2317_v59 = vld [vmem:[#allocation5 + $0x40] sm:$0xf]  ;;  %v3381_v60 = vld [vmem:[#allocation5 + $0x4c] sm:$0xf0]  ;;  %v2718_v62 = vor.u32 %v3481_v55, %v2717_v54  ;;  %1304 = vmatpush.bf16.msra.mxu1 %v2462_v57  ;;  %v2511_v51 = vld [vmem:[#allocation5 + $0x1d0] sm:$0xf0]  ;;  %v2386_v55 = vor.u32 %v3395_v48, %v2383_v49 }
  0x2c   :  { %v2445_v61 = vld [vmem:[#allocation5 + $0x140] sm:$0xf]  ;;  %v3413_v63 = vld [vmem:[#allocation5 + $0x14c] sm:$0xf0]  ;;  %v2318_v4 = vor.u32 %v3381_v60, %v2317_v59  ;;  %1317 = vmatpush.bf16.msra.mxu2 %v2590_v58  ;;  %v2514_v59 = vor.u32 %v3427_v50, %v2511_v51  ;;  %v3391_v60 = vld [vmem:[#allocation5 + $0xa4] sm:$0xf] }
  0x2d   :  { %v2573_v0 = vld [vmem:[#allocation5 + $0x240] sm:$0xf]  ;;  %v3445_v1 = vld [vmem:[#allocation5 + $0x24c] sm:$0xf0]  ;;  %v2446_v5 = vor.u32 %v3413_v63, %v2445_v61  ;;  %1330 = vmatpush.bf16.msra.mxu3 %v2718_v62  ;;  %v2367_v61 = vld [vmem:[#allocation5 + $0xb0] sm:$0xf0] }
  0x2e   :  { %v2701_v2 = vld [vmem:[#allocation5 + $0x340] sm:$0xf]  ;;  %v3477_v3 = vld [vmem:[#allocation5 + $0x34c] sm:$0xf0]  ;;  %v2574_v6 = vor.u32 %v3445_v1, %v2573_v0  ;;  %1292 = vmatpush.bf16.msra.mxu0 %v2318_v4  ;;  %v3423_v62 = vld [vmem:[#allocation5 + $0x1a4] sm:$0xf]  ;;  %v2370_v4 = vor.u32 %v3391_v60, %v2367_v61 }
  0x2f   :  { %v2301_v7 = vld [vmem:[#allocation5 + $0x20] sm:$0xf]  ;;  %v3377_v8 = vld [vmem:[#allocation5 + $0x2c] sm:$0xf0]  ;;  %v2702_v10 = vor.u32 %v3477_v3, %v2701_v2  ;;  %1305 = vmatpush.bf16.msra.mxu1 %v2446_v5  ;;  %v2495_v63 = vld [vmem:[#allocation5 + $0x1b0] sm:$0xf0] }
  0x30   :  { %v2429_v9 = vld [vmem:[#allocation5 + $0x120] sm:$0xf]  ;;  %v3409_v11 = vld [vmem:[#allocation5 + $0x12c] sm:$0xf0]  ;;  %v2302_v16 = vor.u32 %v3377_v8, %v2301_v7  ;;  %1318 = vmatpush.bf16.msra.mxu2 %v2574_v6  ;;  %v101_v3 = vld [vmem:[#allocation2] sm:$0xff] }
  0x31   :  { %v2557_v12 = vld [vmem:[#allocation5 + $0x220] sm:$0xf]  ;;  %v3441_v13 = vld [vmem:[#allocation5 + $0x22c] sm:$0xf0]  ;;  %v2430_v19 = vor.u32 %v3409_v11, %v2429_v9  ;;  %1331 = vmatpush.bf16.msra.mxu3 %v2702_v10  ;;  %v309_v9 = vunpack.c.l.b16 %v101_v3  ;;  %v2498_v11 = vor.u32 %v3423_v62, %v2495_v63 }
  0x32   :  { %v2685_v14 = vld [vmem:[#allocation5 + $0x320] sm:$0xf]  ;;  %v3473_v15 = vld [vmem:[#allocation5 + $0x32c] sm:$0xf0]  ;;  %v2558_v20 = vor.u32 %v3441_v13, %v2557_v12  ;;  %1293 = vmatpush.bf16.msra.mxu0 %v2302_v16  ;;  %v3387_v13 = vld [vmem:[#allocation5 + $0x84] sm:$0xf] }
  0x33   :  { %v2285_v17 = vld [vmem:[#allocation5] sm:$0xf]  ;;  %v3373_v18 = vld [vmem:[#allocation5 + $0xc] sm:$0xf0]  ;;  %v2686_v24 = vor.u32 %v3473_v15, %v2685_v14  ;;  %1306 = vmatpush.bf16.msra.mxu1 %v2430_v19  ;;  %v2351_v14 = vld [vmem:[#allocation5 + $0x90] sm:$0xf0]  ;;  %v310_v15 = vunpack.c.h.b16 %v101_v3  ;;  %v3877_v19 = vpack.c.b16 %v309_v9, %v309_v9 }
  0x34   :  { %v2413_v21 = vld [vmem:[#allocation5 + $0x100] sm:$0xf]  ;;  %v3405_v22 = vld [vmem:[#allocation5 + $0x10c] sm:$0xf0]  ;;  %v2286_v31 = vor.u32 %v3373_v18, %v2285_v17  ;;  %1319 = vmatpush.bf16.msra.mxu2 %v2558_v20  ;;  %v3419_v16 = vld [vmem:[#allocation5 + $0x184] sm:$0xf] }
  0x35   :  { %v2541_v23 = vld [vmem:[#allocation5 + $0x200] sm:$0xf]  ;;  %v3437_v25 = vld [vmem:[#allocation5 + $0x20c] sm:$0xf0]  ;;  %v2414_v35 = vor.u32 %v3405_v22, %v2413_v21  ;;  %1332 = vmatpush.bf16.msra.mxu3 %v2686_v24  ;;  %v2479_v17 = vld [vmem:[#allocation5 + $0x190] sm:$0xf0]  ;;  %v3881_v22 = vpack.c.b16 %v310_v15, %v310_v15  ;;  %v2354_v24 = vor.u32 %v3387_v13, %v2351_v14 }
  0x36   :  { %v2669_v26 = vld [vmem:[#allocation5 + $0x300] sm:$0xf]  ;;  %v3469_v27 = vld [vmem:[#allocation5 + $0x30c] sm:$0xf0]  ;;  %v2542_v36 = vor.u32 %v3437_v25, %v2541_v23  ;;  %1294 = vmatpush.bf16.msra.mxu0 %v2286_v31  ;;  %v2335_v31 = vld [vmem:[#allocation5 + $0x70] sm:$0xf0] }
  0x37   :  { %v2909_v28 = vld [vmem:[#allocation5 + $0x4e0] sm:$0xf]  ;;  %v3529_v29 = vld [vmem:[#allocation5 + $0x4ec] sm:$0xf0]  ;;  %v2670_v39 = vor.u32 %v3469_v27, %v2669_v26  ;;  %1307 = vmatpush.bf16.msra.mxu1 %v2414_v35  ;;  %v3495_v9 = vld [vmem:[#allocation5 + $0x3e4] sm:$0xf] }
  0x38   :  { %v3037_v30 = vld [vmem:[#allocation5 + $0x5e0] sm:$0xf]  ;;  %v3561_v32 = vld [vmem:[#allocation5 + $0x5ec] sm:$0xf0]  ;;  %v2910_v40 = vor.u32 %v3529_v29, %v2909_v28  ;;  %1320 = vmatpush.bf16.msra.mxu2 %v2542_v36  ;;  %v2482_v28 = vor.u32 %v3419_v16, %v2479_v17  ;;  %v2911_v13 = vld [vmem:[#allocation5 + $0x4f0] sm:$0xf0] }
  0x39   :  { %v3038_v41 = vor.u32 %v3561_v32, %v3037_v30  ;;  %v2893_v43 = vld [vmem:[#allocation5 + $0x4c0] sm:$0xf]  ;;  %v3525_v44 = vld [vmem:[#allocation5 + $0x4cc] sm:$0xf0]  ;;  %1333 = vmatpush.bf16.msra.mxu3 %v2670_v39  ;;  %v3383_v30 = vld [vmem:[#allocation5 + $0x64] sm:$0xf]  ;;  %1295 = vmatmul.bf16.vlgmr.msra.gmra.mxu0 %v3877_v19 }
  0x3a   :  { %v3021_v45 = vld [vmem:[#allocation5 + $0x5c0] sm:$0xf]  ;;  %v3557_v47 = vld [vmem:[#allocation5 + $0x5cc] sm:$0xf0]  ;;  %1339 = vmatpush.bf16.msrb.mxu0 %v2910_v40  ;;  %v2894_v52 = vor.u32 %v3525_v44, %v2893_v43  ;;  %v3415_v32 = vld [vmem:[#allocation5 + $0x164] sm:$0xf]  ;;  %1308 = vmatmul.bf16.vlgmr.msra.gmra.mxu1 %v3881_v22  ;;  %v2338_v36 = vor.u32 %v3383_v30, %v2335_v31 }
  0x3b   :  { %v2877_v53 = vld [vmem:[#allocation5 + $0x4a0] sm:$0xf]  ;;  %1352 = vmatpush.bf16.msrb.mxu1 %v3038_v41  ;;  %v3022_v54 = vor.u32 %v3557_v47, %v3021_v45  ;;  %v3521_v56 = vld [vmem:[#allocation5 + $0x4ac] sm:$0xf0]  ;;  %v2466_v40 = vor.u32 %v3415_v32, %v2463_v33  ;;  %v2319_v43 = vld [vmem:[#allocation5 + $0x50] sm:$0xf0] }
  0x3c   :  { %1365 = vmatpush.bf16.msrb.mxu2 %v2402_v42  ;;  %v3005_v57 = vld [vmem:[#allocation5 + $0x5a0] sm:$0xf]  ;;  %v3553_v58 = vld [vmem:[#allocation5 + $0x5ac] sm:$0xf0]  ;;  %v2878_v0 = vor.u32 %v3521_v56, %v2877_v53  ;;  %v3379_v42 = vld [vmem:[#allocation5 + $0x44] sm:$0xf] }
  0x3d   :  { %1378 = vmatpush.bf16.msrb.mxu3 %v2530_v46  ;;  %v3006_v1 = vor.u32 %v3553_v58, %v3005_v57  ;;  %v102_v2 = vld [vmem:[#allocation2 + $0x8] sm:$0xff]  ;;  %v2861_v5 = vld [vmem:[#allocation5 + $0x480] sm:$0xf]  ;;  %v3411_v44 = vld [vmem:[#allocation5 + $0x144] sm:$0xf]  ;;  %v2322_v48 = vor.u32 %v3379_v42, %v2319_v43 }
  0x3e   :  { %1340 = vmatpush.bf16.msrb.mxu0 %v2894_v52  ;;  %v3517_v6 = vld [vmem:[#allocation5 + $0x48c] sm:$0xf0]  ;;  %v2989_v7 = vld [vmem:[#allocation5 + $0x580] sm:$0xf]  ;;  %v311_v8 = vunpack.c.l.b16 %v102_v2  ;;  %v312_v10 = vunpack.c.h.b16 %v102_v2  ;;  %v2447_v45 = vld [vmem:[#allocation5 + $0x150] sm:$0xf0] }
  0x3f   :  { %1353 = vmatpush.bf16.msrb.mxu1 %v3022_v54  ;;  %v3549_v12 = vld [vmem:[#allocation5 + $0x58c] sm:$0xf0]  ;;  %v2862_v21 = vor.u32 %v3517_v6, %v2861_v5  ;;  %v2845_v25 = vld [vmem:[#allocation5 + $0x460] sm:$0xf]  ;;  %v2450_v52 = vor.u32 %v3411_v44, %v2447_v45  ;;  %v3375_v54 = vld [vmem:[#allocation5 + $0x24] sm:$0xf] }
  0x40   :  { %1366 = vmatpush.bf16.msrb.mxu2 %v2386_v55  ;;  %v3875_v18 = vpack.c.b16 %v311_v8, %v311_v8  ;;  %v3879_v20 = vpack.c.b16 %v312_v10, %v312_v10  ;;  %v2990_v23 = vor.u32 %v3549_v12, %v2989_v7  ;;  %v3513_v26 = vld [vmem:[#allocation5 + $0x46c] sm:$0xf0]  ;;  %v2973_v27 = vld [vmem:[#allocation5 + $0x560] sm:$0xf]  ;;  %v2303_v55 = vld [vmem:[#allocation5 + $0x30] sm:$0xf0] }
  0x41   :  { %1379 = vmatpush.bf16.msrb.mxu3 %v2514_v59  ;;  %v3545_v29 = vld [vmem:[#allocation5 + $0x56c] sm:$0xf0]  ;;  %v2846_v34 = vor.u32 %v3513_v26, %v2845_v25  ;;  %v2829_v37 = vld [vmem:[#allocation5 + $0x440] sm:$0xf]  ;;  %v3407_v56 = vld [vmem:[#allocation5 + $0x124] sm:$0xf]  ;;  %v2306_v63 = vor.u32 %v3375_v54, %v2303_v55 }
  0x42   :  { %1341 = vmatpush.bf16.msrb.mxu0 %v2878_v0  ;;  %1321 = vmatmul.bf16.vlgmr.msra.gmra.mxu2 %v3875_v18  ;;  %v2974_v35 = vor.u32 %v3545_v29, %v2973_v27  ;;  %v3509_v38 = vld [vmem:[#allocation5 + $0x44c] sm:$0xf0]  ;;  %v2957_v39 = vld [vmem:[#allocation5 + $0x540] sm:$0xf]  ;;  %v2431_v57 = vld [vmem:[#allocation5 + $0x130] sm:$0xf0] }
  0x43   :  { %1354 = vmatpush.bf16.msrb.mxu1 %v3006_v1  ;;  %1334 = vmatmul.bf16.vlgmr.msra.gmra.mxu3 %v3879_v20  ;;  %v3541_v41 = vld [vmem:[#allocation5 + $0x54c] sm:$0xf0]  ;;  %v2830_v46 = vor.u32 %v3509_v38, %v2829_v37  ;;  %v2813_v49 = vld [vmem:[#allocation5 + $0x420] sm:$0xf]  ;;  %v3371_v1 = vld [vmem:[#allocation5 + $0x4] sm:$0xf]  ;;  %v2434_v3 = vor.u32 %v3407_v56, %v2431_v57 }
  0x44   :  { %1367 = vmatpush.bf16.msrb.mxu2 %v2370_v4  ;;  %v2958_v47 = vor.u32 %v3541_v41, %v2957_v39  ;;  %v3505_v50 = vld [vmem:[#allocation5 + $0x42c] sm:$0xf0]  ;;  %v2941_v51 = vld [vmem:[#allocation5 + $0x520] sm:$0xf]  ;;  %v103_v2 = vld [vmem:[#allocation2 + $0x10] sm:$0xff] }
  0x45   :  { %1380 = vmatpush.bf16.msrb.mxu3 %v2498_v11  ;;  %v3537_v53 = vld [vmem:[#allocation5 + $0x52c] sm:$0xf0]  ;;  %v2814_v58 = vor.u32 %v3505_v50, %v2813_v49  ;;  %v2797_v59 = vld [vmem:[#allocation5 + $0x400] sm:$0xf]  ;;  %v2287_v4 = vld [vmem:[#allocation5 + $0x10] sm:$0xf0]  ;;  %v313_v14 = vunpack.c.l.b16 %v103_v2 }
  0x46   :  { %1342 = vmatpush.bf16.msrb.mxu0 %v2862_v21  ;;  %v3501_v60 = vld [vmem:[#allocation5 + $0x40c] sm:$0xf0]  ;;  %v2925_v61 = vld [vmem:[#allocation5 + $0x500] sm:$0xf]  ;;  %v2942_v62 = vor.u32 %v3537_v53, %v2941_v51  ;;  %v3403_v5 = vld [vmem:[#allocation5 + $0x104] sm:$0xf]  ;;  %v2290_v16 = vor.u32 %v3371_v1, %v2287_v4 }
  0x47   :  { %1355 = vmatpush.bf16.msrb.mxu1 %v2990_v23  ;;  %v3533_v0 = vld [vmem:[#allocation5 + $0x50c] sm:$0xf0]  ;;  %v2415_v6 = vld [vmem:[#allocation5 + $0x110] sm:$0xf0]  ;;  %v3463_v7 = vld [vmem:[#allocation5 + $0x2e4] sm:$0xf]  ;;  %v2798_v10 = vor.u32 %v3501_v60, %v2797_v59  ;;  %v314_v23 = vunpack.c.h.b16 %v103_v2 }
  0x48   :  { %1368 = vmatpush.bf16.msrb.mxu2 %v2354_v24  ;;  %v2655_v8 = vld [vmem:[#allocation5 + $0x2f0] sm:$0xf0]  ;;  %v3527_v12 = vld [vmem:[#allocation5 + $0x4e4] sm:$0xf]  ;;  %v2926_v15 = vor.u32 %v3533_v0, %v2925_v61  ;;  %v2418_v24 = vor.u32 %v3403_v5, %v2415_v6 }
  0x49   :  { %1381 = vmatpush.bf16.msrb.mxu3 %v2482_v28  ;;  %v2783_v11 = vld [vmem:[#allocation5 + $0x3f0] sm:$0xf0]  ;;  %v3559_v17 = vld [vmem:[#allocation5 + $0x5e4] sm:$0xf]  ;;  %v2658_v25 = vor.u32 %v3463_v7, %v2655_v8  ;;  %v2914_v27 = vor.u32 %v3527_v12, %v2911_v13  ;;  %v3889_v38 = vpack.c.b16 %v314_v23, %v314_v23 }
  0x4a   :  { %1343 = vmatpush.bf16.msrb.mxu0 %v2846_v34  ;;  %v3039_v21 = vld [vmem:[#allocation5 + $0x5f0] sm:$0xf0]  ;;  %v2786_v26 = vor.u32 %v3495_v9, %v2783_v11  ;;  %v3459_v28 = vld [vmem:[#allocation5 + $0x2c4] sm:$0xf] }
  0x4b   :  { %1356 = vmatpush.bf16.msrb.mxu1 %v2974_v35  ;;  %v2639_v29 = vld [vmem:[#allocation5 + $0x2d0] sm:$0xf0]  ;;  %v3491_v30 = vld [vmem:[#allocation5 + $0x3c4] sm:$0xf]  ;;  %v3042_v31 = vor.u32 %v3559_v17, %v3039_v21  ;;  %v3887_v35 = vpack.c.b16 %v313_v14, %v313_v14 }
  0x4c   :  { %1369 = vmatpush.bf16.msrb.mxu2 %v2338_v36  ;;  %v2767_v32 = vld [vmem:[#allocation5 + $0x3d0] sm:$0xf0]  ;;  %v3523_v33 = vld [vmem:[#allocation5 + $0x4c4] sm:$0xf]  ;;  %v2642_v39 = vor.u32 %v3459_v28, %v2639_v29 }
  0x4d   :  { %1382 = vmatpush.bf16.msrb.mxu3 %v2466_v40  ;;  %v2895_v34 = vld [vmem:[#allocation5 + $0x4d0] sm:$0xf0]  ;;  %v3555_v36 = vld [vmem:[#allocation5 + $0x5c4] sm:$0xf]  ;;  %v2770_v40 = vor.u32 %v3491_v30, %v2767_v32 }
  0x4e   :  { %1344 = vmatpush.bf16.msrb.mxu0 %v2830_v46  ;;  %v3023_v37 = vld [vmem:[#allocation5 + $0x5d0] sm:$0xf0]  ;;  %v2898_v41 = vor.u32 %v3523_v33, %v2895_v34  ;;  %v3455_v42 = vld [vmem:[#allocation5 + $0x2a4] sm:$0xf] }
  0x4f   :  { %1357 = vmatpush.bf16.msrb.mxu1 %v2958_v47  ;;  %v2623_v43 = vld [vmem:[#allocation5 + $0x2b0] sm:$0xf0]  ;;  %v3487_v44 = vld [vmem:[#allocation5 + $0x3a4] sm:$0xf]  ;;  %v3026_v45 = vor.u32 %v3555_v36, %v3023_v37 }
  0x50   :  { %1370 = vmatpush.bf16.msrb.mxu2 %v2322_v48  ;;  %v2751_v46 = vld [vmem:[#allocation5 + $0x3b0] sm:$0xf0]  ;;  %v3519_v47 = vld [vmem:[#allocation5 + $0x4a4] sm:$0xf]  ;;  %v2626_v51 = vor.u32 %v3455_v42, %v2623_v43 }
  0x51   :  { %1383 = vmatpush.bf16.msrb.mxu3 %v2450_v52  ;;  %v2879_v48 = vld [vmem:[#allocation5 + $0x4b0] sm:$0xf0]  ;;  %v3551_v49 = vld [vmem:[#allocation5 + $0x5a4] sm:$0xf]  ;;  %v2754_v52 = vor.u32 %v3487_v44, %v2751_v46 }
  0x52   :  { %1345 = vmatpush.bf16.msrb.mxu0 %v2814_v58  ;;  %v3007_v50 = vld [vmem:[#allocation5 + $0x5b0] sm:$0xf0]  ;;  %v2882_v53 = vor.u32 %v3519_v47, %v2879_v48  ;;  %v3451_v54 = vld [vmem:[#allocation5 + $0x284] sm:$0xf] }
  0x53   :  { %1358 = vmatpush.bf16.msrb.mxu1 %v2942_v62  ;;  %v2607_v55 = vld [vmem:[#allocation5 + $0x290] sm:$0xf0]  ;;  %v3483_v56 = vld [vmem:[#allocation5 + $0x384] sm:$0xf]  ;;  %v3010_v57 = vor.u32 %v3551_v49, %v3007_v50 }
  0x54   :  { %1371 = vmatpush.bf16.msrb.mxu2 %v2306_v63  ;;  %v2735_v58 = vld [vmem:[#allocation5 + $0x390] sm:$0xf0]  ;;  %v3515_v59 = vld [vmem:[#allocation5 + $0x484] sm:$0xf]  ;;  %v2610_v63 = vor.u32 %v3451_v54, %v2607_v55  ;;  %v3402_v54 = vld [vmem:[#allocation5 + $0xf4] sm:$0xf0] }
  0x55   :  { %1384 = vmatpush.bf16.msrb.mxu3 %v2434_v3  ;;  %v2863_v60 = vld [vmem:[#allocation5 + $0x490] sm:$0xf0]  ;;  %v3547_v61 = vld [vmem:[#allocation5 + $0x584] sm:$0xf]  ;;  %v2738_v0 = vor.u32 %v3483_v56, %v2735_v58  ;;  %v2533_v55 = vld [vmem:[#allocation5 + $0x1e8] sm:$0xf] }
  0x56   :  { %1346 = vmatpush.bf16.msrb.mxu0 %v2798_v10  ;;  %v2991_v62 = vld [vmem:[#allocation5 + $0x590] sm:$0xf0]  ;;  %v2866_v1 = vor.u32 %v3515_v59, %v2863_v60  ;;  %v3447_v2 = vld [vmem:[#allocation5 + $0x264] sm:$0xf]  ;;  %v2661_v58 = vld [vmem:[#allocation5 + $0x2e8] sm:$0xf] }
  0x57   :  { %1359 = vmatpush.bf16.msrb.mxu1 %v2926_v15  ;;  %v2591_v3 = vld [vmem:[#allocation5 + $0x270] sm:$0xf0]  ;;  %v3479_v4 = vld [vmem:[#allocation5 + $0x364] sm:$0xf]  ;;  %v2994_v5 = vor.u32 %v3547_v61, %v2991_v62  ;;  %v3466_v59 = vld [vmem:[#allocation5 + $0x2f4] sm:$0xf0] }
  0x58   :  { %1372 = vmatpush.bf16.msrb.mxu2 %v2290_v16  ;;  %v2719_v6 = vld [vmem:[#allocation5 + $0x370] sm:$0xf0]  ;;  %v3511_v7 = vld [vmem:[#allocation5 + $0x464] sm:$0xf]  ;;  %v2594_v11 = vor.u32 %v3447_v2, %v2591_v3  ;;  %v2789_v62 = vld [vmem:[#allocation5 + $0x3e8] sm:$0xf]  ;;  %v2662_v3 = vor.u32 %v3466_v59, %v2661_v58 }
  0x59   :  { %1385 = vmatpush.bf16.msrb.mxu3 %v2418_v24  ;;  %1347 = vmatmul.bf16.vlgmr.msrb.gmra.mxu0 %v3887_v35  ;;  %v2847_v8 = vld [vmem:[#allocation5 + $0x470] sm:$0xf0]  ;;  %v3543_v9 = vld [vmem:[#allocation5 + $0x564] sm:$0xf]  ;;  %v2722_v12 = vor.u32 %v3479_v4, %v2719_v6  ;;  %v2389_v4 = vld [vmem:[#allocation5 + $0xc8] sm:$0xf] }
  0x5a   :  { %1391 = vmatpush.bf16.msra.mxu0 %v2658_v25  ;;  %1360 = vmatmul.bf16.vlgmr.msrb.gmra.mxu1 %v3889_v38  ;;  %v2975_v10 = vld [vmem:[#allocation5 + $0x570] sm:$0xf0]  ;;  %v2850_v13 = vor.u32 %v3511_v7, %v2847_v8  ;;  %v3443_v14 = vld [vmem:[#allocation5 + $0x244] sm:$0xf]  ;;  %v2517_v6 = vld [vmem:[#allocation5 + $0x1c8] sm:$0xf] }
  0x5b   :  { %1404 = vmatpush.bf16.msra.mxu1 %v2786_v26  ;;  %1373 = vmatmul.bf16.vlgmr.msrb.gmra.mxu2 %v3877_v19  ;;  %v2575_v15 = vld [vmem:[#allocation5 + $0x250] sm:$0xf0]  ;;  %v3475_v16 = vld [vmem:[#allocation5 + $0x344] sm:$0xf]  ;;  %v2978_v17 = vor.u32 %v3543_v9, %v2975_v10  ;;  %v3430_v8 = vld [vmem:[#allocation5 + $0x1d4] sm:$0xf0] }
  0x5c   :  { %1417 = vmatpush.bf16.msra.mxu2 %v2914_v27  ;;  %1386 = vmatmul.bf16.vlgmr.msrb.gmra.mxu3 %v3881_v22  ;;  %v2703_v21 = vld [vmem:[#allocation5 + $0x350] sm:$0xf0]  ;;  %v3507_v23 = vld [vmem:[#allocation5 + $0x444] sm:$0xf]  ;;  %v2578_v27 = vor.u32 %v3443_v14, %v2575_v15  ;;  %v2645_v9 = vld [vmem:[#allocation5 + $0x2c8] sm:$0xf]  ;;  %v2518_v14 = vor.u32 %v3430_v8, %v2517_v6 }
  0x5d   :  { %1430 = vmatpush.bf16.msra.mxu3 %v3042_v31  ;;  %v2831_v24 = vld [vmem:[#allocation5 + $0x450] sm:$0xf0]  ;;  %v3539_v25 = vld [vmem:[#allocation5 + $0x544] sm:$0xf]  ;;  %v2706_v28 = vor.u32 %v3475_v16, %v2703_v21  ;;  %v3462_v10 = vld [vmem:[#allocation5 + $0x2d4] sm:$0xf0] }
  0x5e   :  { %1392 = vmatpush.bf16.msra.mxu0 %v2642_v39  ;;  %v2959_v26 = vld [vmem:[#allocation5 + $0x550] sm:$0xf0]  ;;  %v2834_v29 = vor.u32 %v3507_v23, %v2831_v24  ;;  %v3439_v30 = vld [vmem:[#allocation5 + $0x224] sm:$0xf]  ;;  %v2646_v15 = vor.u32 %v3462_v10, %v2645_v9  ;;  %v2373_v16 = vld [vmem:[#allocation5 + $0xa8] sm:$0xf] }
  0x5f   :  { %1405 = vmatpush.bf16.msra.mxu1 %v2770_v40  ;;  %v2559_v31 = vld [vmem:[#allocation5 + $0x230] sm:$0xf0]  ;;  %v3471_v32 = vld [vmem:[#allocation5 + $0x324] sm:$0xf]  ;;  %v2962_v33 = vor.u32 %v3539_v25, %v2959_v26  ;;  %v2501_v21 = vld [vmem:[#allocation5 + $0x1a8] sm:$0xf] }
  0x60   :  { %1418 = vmatpush.bf16.msra.mxu2 %v2898_v41  ;;  %v2687_v34 = vld [vmem:[#allocation5 + $0x330] sm:$0xf0]  ;;  %v3503_v36 = vld [vmem:[#allocation5 + $0x424] sm:$0xf]  ;;  %v2562_v41 = vor.u32 %v3439_v30, %v2559_v31  ;;  %v3426_v24 = vld [vmem:[#allocation5 + $0x1b4] sm:$0xf0] }
  0x61   :  { %1431 = vmatpush.bf16.msra.mxu3 %v3026_v45  ;;  %v2815_v37 = vld [vmem:[#allocation5 + $0x430] sm:$0xf0]  ;;  %v3535_v39 = vld [vmem:[#allocation5 + $0x524] sm:$0xf]  ;;  %v2690_v44 = vor.u32 %v3471_v32, %v2687_v34  ;;  %v2629_v25 = vld [vmem:[#allocation5 + $0x2a8] sm:$0xf]  ;;  %v2502_v30 = vor.u32 %v3426_v24, %v2501_v21 }
  0x62   :  { %1393 = vmatpush.bf16.msra.mxu0 %v2626_v51  ;;  %v2943_v40 = vld [vmem:[#allocation5 + $0x530] sm:$0xf0]  ;;  %v3435_v42 = vld [vmem:[#allocation5 + $0x204] sm:$0xf]  ;;  %v2818_v45 = vor.u32 %v3503_v36, %v2815_v37  ;;  %v3458_v26 = vld [vmem:[#allocation5 + $0x2b4] sm:$0xf0] }
  0x63   :  { %1406 = vmatpush.bf16.msra.mxu1 %v2754_v52  ;;  %v2543_v43 = vld [vmem:[#allocation5 + $0x210] sm:$0xf0]  ;;  %v3467_v46 = vld [vmem:[#allocation5 + $0x304] sm:$0xf]  ;;  %v2946_v49 = vor.u32 %v3535_v39, %v2943_v40  ;;  %v2630_v31 = vor.u32 %v3458_v26, %v2629_v25  ;;  %v2357_v32 = vld [vmem:[#allocation5 + $0x88] sm:$0xf] }
  0x64   :  { %1419 = vmatpush.bf16.msra.mxu2 %v2882_v53  ;;  %v2671_v47 = vld [vmem:[#allocation5 + $0x310] sm:$0xf0]  ;;  %v3499_v48 = vld [vmem:[#allocation5 + $0x404] sm:$0xf]  ;;  %v2405_v53 = vld [vmem:[#allocation5 + $0xe8] sm:$0xf]  ;;  %v2546_v56 = vor.u32 %v3435_v42, %v2543_v43 }
  0x65   :  { %1432 = vmatpush.bf16.msra.mxu3 %v3010_v57  ;;  %v2799_v50 = vld [vmem:[#allocation5 + $0x410] sm:$0xf0]  ;;  %v3531_v51 = vld [vmem:[#allocation5 + $0x504] sm:$0xf]  ;;  %v3434_v57 = vld [vmem:[#allocation5 + $0x1f4] sm:$0xf0]  ;;  %v2674_v60 = vor.u32 %v3467_v46, %v2671_v47 }
  0x66   :  { %1394 = vmatpush.bf16.msra.mxu0 %v2610_v63  ;;  %v2927_v52 = vld [vmem:[#allocation5 + $0x510] sm:$0xf0]  ;;  %v2802_v61 = vor.u32 %v3499_v48, %v2799_v50  ;;  %v3498_v63 = vld [vmem:[#allocation5 + $0x3f4] sm:$0xf0]  ;;  %v2534_v2 = vor.u32 %v3434_v57, %v2533_v55  ;;  %v2485_v34 = vld [vmem:[#allocation5 + $0x188] sm:$0xf] }
  0x67   :  { %1407 = vmatpush.bf16.msra.mxu1 %v2738_v0  ;;  %v2930_v0 = vor.u32 %v3531_v51, %v2927_v52  ;;  %v2790_v7 = vor.u32 %v3498_v63, %v2789_v62  ;;  %v3422_v37 = vld [vmem:[#allocation5 + $0x194] sm:$0xf0]  ;;  %v2613_v39 = vld [vmem:[#allocation5 + $0x288] sm:$0xf] }
  0x68   :  { %1420 = vmatpush.bf16.msra.mxu2 %v2866_v1  ;;  %v2406_v1 = vor.u32 %v3402_v54, %v2405_v53  ;;  %v3454_v40 = vld [vmem:[#allocation5 + $0x294] sm:$0xf0]  ;;  %v2341_v46 = vld [vmem:[#allocation5 + $0x68] sm:$0xf] }
  0x69   :  { %1433 = vmatpush.bf16.msra.mxu3 %v2994_v5  ;;  %v3398_v5 = vld [vmem:[#allocation5 + $0xd4] sm:$0xf0]  ;;  %v2469_v48 = vld [vmem:[#allocation5 + $0x168] sm:$0xf] }
  0x6a   :  { %1395 = vmatpush.bf16.msra.mxu0 %v2594_v11  ;;  %v2773_v11 = vld [vmem:[#allocation5 + $0x3c8] sm:$0xf]  ;;  %v3486_v42 = vld [vmem:[#allocation5 + $0x394] sm:$0xf0] }
  0x6b   :  { %1408 = vmatpush.bf16.msra.mxu1 %v2722_v12  ;;  %v3494_v12 = vld [vmem:[#allocation5 + $0x3d4] sm:$0xf0]  ;;  %v2597_v51 = vld [vmem:[#allocation5 + $0x268] sm:$0xf] }
  0x6c   :  { %1421 = vmatpush.bf16.msra.mxu2 %v2850_v13  ;;  %v2390_v13 = vor.u32 %v3398_v5, %v2389_v4  ;;  %v2774_v23 = vor.u32 %v3494_v12, %v2773_v11  ;;  %v3386_v47 = vld [vmem:[#allocation5 + $0x74] sm:$0xf0]  ;;  %v2725_v53 = vld [vmem:[#allocation5 + $0x368] sm:$0xf] }
  0x6d   :  { %1434 = vmatpush.bf16.msra.mxu3 %v2978_v17  ;;  %v3394_v17 = vld [vmem:[#allocation5 + $0xb4] sm:$0xf0]  ;;  %v2342_v55 = vor.u32 %v3386_v47, %v2341_v46  ;;  %v2325_v58 = vld [vmem:[#allocation5 + $0x48] sm:$0xf] }
  0x6e   :  { %1396 = vmatpush.bf16.msra.mxu0 %v2578_v27  ;;  %v2757_v27 = vld [vmem:[#allocation5 + $0x3a8] sm:$0xf]  ;;  %v3418_v50 = vld [vmem:[#allocation5 + $0x174] sm:$0xf0] }
  0x6f   :  { %1409 = vmatpush.bf16.msra.mxu1 %v2706_v28  ;;  %v3490_v28 = vld [vmem:[#allocation5 + $0x3b4] sm:$0xf0]  ;;  %v2581_v63 = vld [vmem:[#allocation5 + $0x248] sm:$0xf] }
  0x70   :  { %1422 = vmatpush.bf16.msra.mxu2 %v2834_v29  ;;  %v2374_v29 = vor.u32 %v3394_v17, %v2373_v16  ;;  %v2758_v36 = vor.u32 %v3490_v28, %v2757_v27  ;;  %v3450_v52 = vld [vmem:[#allocation5 + $0x274] sm:$0xf0]  ;;  %v2309_v6 = vld [vmem:[#allocation5 + $0x28] sm:$0xf] }
  0x71   :  { %1435 = vmatpush.bf16.msra.mxu3 %v2962_v33  ;;  %v3390_v33 = vld [vmem:[#allocation5 + $0x94] sm:$0xf0]  ;;  %v2598_v57 = vor.u32 %v3450_v52, %v2597_v51  ;;  %v2437_v8 = vld [vmem:[#allocation5 + $0x128] sm:$0xf] }
  0x72   :  { %1397 = vmatpush.bf16.msra.mxu0 %v2562_v41  ;;  %v2741_v41 = vld [vmem:[#allocation5 + $0x388] sm:$0xf]  ;;  %v2358_v43 = vor.u32 %v3390_v33, %v2357_v32  ;;  %v3482_v54 = vld [vmem:[#allocation5 + $0x374] sm:$0xf0] }
  0x73   :  { %1410 = vmatpush.bf16.msra.mxu1 %v2690_v44  ;;  %v2486_v44 = vor.u32 %v3422_v37, %v2485_v34  ;;  %v3382_v59 = vld [vmem:[#allocation5 + $0x54] sm:$0xf0]  ;;  %v2565_v11 = vld [vmem:[#allocation5 + $0x228] sm:$0xf]  ;;  %v3400_v37 = vld [vmem:[#allocation5 + $0xec] sm:$0xf] }
  0x74   :  { %1423 = vmatpush.bf16.msra.mxu2 %v2818_v45  ;;  %v2614_v45 = vor.u32 %v3454_v40, %v2613_v39  ;;  %v3414_v62 = vld [vmem:[#allocation5 + $0x154] sm:$0xf0]  ;;  %v2293_v16 = vld [vmem:[#allocation5 + $0x8] sm:$0xf]  ;;  %v2407_v39 = vld [vmem:[#allocation5 + $0xf8] sm:$0xf0] }
  0x75   :  { %1436 = vmatpush.bf16.msra.mxu3 %v2946_v49  ;;  %v2742_v49 = vor.u32 %v3486_v42, %v2741_v41  ;;  %v3410_v10 = vld [vmem:[#allocation5 + $0x134] sm:$0xf0]  ;;  %v2421_v24 = vld [vmem:[#allocation5 + $0x108] sm:$0xf]  ;;  %v3432_v42 = vld [vmem:[#allocation5 + $0x1ec] sm:$0xf]  ;;  %v2410_v47 = vor.u32 %v3400_v37, %v2407_v39 }
  0x76   :  { %1398 = vmatpush.bf16.msra.mxu0 %v2546_v56  ;;  %v2470_v56 = vor.u32 %v3418_v50, %v2469_v48  ;;  %v3442_v12 = vld [vmem:[#allocation5 + $0x234] sm:$0xf0]  ;;  %v2438_v21 = vor.u32 %v3410_v10, %v2437_v8  ;;  %v2549_v26 = vld [vmem:[#allocation5 + $0x208] sm:$0xf] }
  0x77   :  { %1411 = vmatpush.bf16.msra.mxu1 %v2674_v60  ;;  %v2453_v60 = vld [vmem:[#allocation5 + $0x148] sm:$0xf]  ;;  %v3374_v17 = vld [vmem:[#allocation5 + $0x14] sm:$0xf0] }
  0x78   :  { %1424 = vmatpush.bf16.msra.mxu2 %v2802_v61  ;;  %v2726_v61 = vor.u32 %v3482_v54, %v2725_v53  ;;  %v2454_v4 = vor.u32 %v3414_v62, %v2453_v60  ;;  %v3406_v25 = vld [vmem:[#allocation5 + $0x114] sm:$0xf0]  ;;  %v3045_v33 = vld [vmem:[#allocation5 + $0x5e8] sm:$0xf]  ;;  %v2294_v34 = vor.u32 %v3374_v17, %v2293_v16  ;;  %v3396_v53 = vld [vmem:[#allocation5 + $0xcc] sm:$0xf] }
  0x79   :  { %1437 = vmatpush.bf16.msra.mxu3 %v2930_v0  ;;  %1399 = vmatmul.bf16.vlgmr.msra.gmra.mxu0 %v3875_v18  ;;  %v3446_v0 = vld [vmem:[#allocation5 + $0x254] sm:$0xf0]  ;;  %v2422_v40 = vor.u32 %v3406_v25, %v2421_v24  ;;  %v2901_v48 = vld [vmem:[#allocation5 + $0x4c8] sm:$0xf]  ;;  %v2391_v54 = vld [vmem:[#allocation5 + $0xd8] sm:$0xf0] }
  0x7a   :  { %1443 = vmatpush.bf16.msrb.mxu0 %v2406_v1  ;;  %1412 = vmatmul.bf16.vlgmr.msra.gmra.mxu1 %v3879_v20  ;;  %v2709_v1 = vld [vmem:[#allocation5 + $0x348] sm:$0xf]  ;;  %v2582_v5 = vor.u32 %v3446_v0, %v2581_v63  ;;  %v3438_v28 = vld [vmem:[#allocation5 + $0x214] sm:$0xf0]  ;;  %v2487_v16 = vld [vmem:[#allocation5 + $0x198] sm:$0xf0] }
  0x7b   :  { %1456 = vmatpush.bf16.msrb.mxu1 %v2534_v2  ;;  %1425 = vmatmul.bf16.vlgmr.msra.gmra.mxu2 %v3887_v35  ;;  %v3478_v2 = vld [vmem:[#allocation5 + $0x354] sm:$0xf0]  ;;  %v2550_v41 = vor.u32 %v3438_v28, %v2549_v26  ;;  %v3029_v50 = vld [vmem:[#allocation5 + $0x5c8] sm:$0xf] }
  0x7c   :  { %1469 = vmatpush.bf16.msrb.mxu2 %v2662_v3  ;;  %1438 = vmatmul.bf16.vlgmr.msra.gmra.mxu3 %v3889_v38  ;;  %v2326_v3 = vor.u32 %v3382_v59, %v2325_v58  ;;  %v2710_v9 = vor.u32 %v3478_v2, %v2709_v1  ;;  %v3530_v32 = vld [vmem:[#allocation5 + $0x4f4] sm:$0xf0]  ;;  %v2394_v59 = vor.u32 %v3396_v53, %v2391_v54  ;;  %v2885_v60 = vld [vmem:[#allocation5 + $0x4a8] sm:$0xf]  ;;  %v3392_v1 = vld [vmem:[#allocation5 + $0xac] sm:$0xf] }
  0x7d   :  { %1482 = vmatpush.bf16.msrb.mxu3 %v2790_v7  ;;  %v3378_v7 = vld [vmem:[#allocation5 + $0x34] sm:$0xf0]  ;;  %v3013_v62 = vld [vmem:[#allocation5 + $0x5a8] sm:$0xf]  ;;  %v2375_v2 = vld [vmem:[#allocation5 + $0xb8] sm:$0xf0] }
  0x7e   :  { %1444 = vmatpush.bf16.msrb.mxu0 %v2390_v13  ;;  %v2693_v13 = vld [vmem:[#allocation5 + $0x328] sm:$0xf]  ;;  %v3558_v52 = vld [vmem:[#allocation5 + $0x5d4] sm:$0xf0] }
  0x7f   :  { %1457 = vmatpush.bf16.msrb.mxu1 %v2518_v14  ;;  %v3474_v14 = vld [vmem:[#allocation5 + $0x334] sm:$0xf0]  ;;  %v3030_v58 = vor.u32 %v3558_v52, %v3029_v50  ;;  %v2869_v8 = vld [vmem:[#allocation5 + $0x488] sm:$0xf] }
  0x80   :  { %1470 = vmatpush.bf16.msrb.mxu2 %v2646_v15  ;;  %v2310_v15 = vor.u32 %v3378_v7, %v2309_v6  ;;  %v2694_v27 = vor.u32 %v3474_v14, %v2693_v13  ;;  %v3554_v0 = vld [vmem:[#allocation5 + $0x5b4] sm:$0xf0]  ;;  %v2378_v7 = vor.u32 %v3392_v1, %v2375_v2  ;;  %v2997_v10 = vld [vmem:[#allocation5 + $0x588] sm:$0xf]  ;;  %v3388_v13 = vld [vmem:[#allocation5 + $0x8c] sm:$0xf] }
  0x81   :  { %1483 = vmatpush.bf16.msrb.mxu3 %v2774_v23  ;;  %v2566_v23 = vor.u32 %v3442_v12, %v2565_v11  ;;  %v3014_v6 = vor.u32 %v3554_v0, %v3013_v62  ;;  %v3550_v12 = vld [vmem:[#allocation5 + $0x594] sm:$0xf0]  ;;  %v2359_v14 = vld [vmem:[#allocation5 + $0x98] sm:$0xf0]  ;;  %v2853_v24 = vld [vmem:[#allocation5 + $0x468] sm:$0xf] }
  0x82   :  { %1445 = vmatpush.bf16.msrb.mxu0 %v2374_v29  ;;  %v2677_v29 = vld [vmem:[#allocation5 + $0x308] sm:$0xf]  ;;  %v3514_v25 = vld [vmem:[#allocation5 + $0x474] sm:$0xf0]  ;;  %v3372_v2 = vld [vmem:[#allocation5 + $0xc] sm:$0xf] }
  0x83   :  { %1458 = vmatpush.bf16.msrb.mxu1 %v2502_v30  ;;  %v3470_v30 = vld [vmem:[#allocation5 + $0x314] sm:$0xf0]  ;;  %v2981_v26 = vld [vmem:[#allocation5 + $0x568] sm:$0xf] }
  0x84   :  { %1471 = vmatpush.bf16.msrb.mxu2 %v2630_v31  ;;  %v2917_v31 = vld [vmem:[#allocation5 + $0x4e8] sm:$0xf]  ;;  %v3546_v28 = vld [vmem:[#allocation5 + $0x574] sm:$0xf0] }
  0x85   :  { %1484 = vmatpush.bf16.msrb.mxu3 %v2758_v36  ;;  %v3562_v36 = vld [vmem:[#allocation5 + $0x5f4] sm:$0xf0]  ;;  %v2837_v37 = vld [vmem:[#allocation5 + $0x448] sm:$0xf] }
  0x86   :  { %1446 = vmatpush.bf16.msrb.mxu0 %v2358_v43  ;;  %v2535_v43 = vld [vmem:[#allocation5 + $0x1f8] sm:$0xf0]  ;;  %v3046_v46 = vor.u32 %v3562_v36, %v3045_v33  ;;  %v2854_v33 = vor.u32 %v3514_v25, %v2853_v24  ;;  %v3510_v39 = vld [vmem:[#allocation5 + $0x454] sm:$0xf0]  ;;  %v2821_v50 = vld [vmem:[#allocation5 + $0x428] sm:$0xf] }
  0x87   :  { %1459 = vmatpush.bf16.msrb.mxu1 %v2486_v44  ;;  %v2678_v44 = vor.u32 %v3470_v30, %v2677_v29  ;;  %v2538_v51 = vor.u32 %v3432_v42, %v2535_v43  ;;  %v3384_v29 = vld [vmem:[#allocation5 + $0x6c] sm:$0xf]  ;;  %v2343_v30 = vld [vmem:[#allocation5 + $0x78] sm:$0xf0]  ;;  %v3542_v42 = vld [vmem:[#allocation5 + $0x554] sm:$0xf0] }
  0x88   :  { %1472 = vmatpush.bf16.msrb.mxu2 %v2614_v45  ;;  %v2918_v45 = vor.u32 %v3530_v32, %v2917_v31  ;;  %v3416_v31 = vld [vmem:[#allocation5 + $0x16c] sm:$0xf]  ;;  %v2471_v32 = vld [vmem:[#allocation5 + $0x178] sm:$0xf0]  ;;  %v2346_v36 = vor.u32 %v3384_v29, %v2343_v30  ;;  %v2949_v52 = vld [vmem:[#allocation5 + $0x528] sm:$0xf] }
  0x89   :  { %1485 = vmatpush.bf16.msrb.mxu3 %v2742_v49  ;;  %v3526_v49 = vld [vmem:[#allocation5 + $0x4d4] sm:$0xf0]  ;;  %v3380_v43 = vld [vmem:[#allocation5 + $0x4c] sm:$0xf]  ;;  %v2933_v0 = vld [vmem:[#allocation5 + $0x508] sm:$0xf] }
  0x8a   :  { %1447 = vmatpush.bf16.msrb.mxu0 %v2342_v55  ;;  %v3428_v55 = vld [vmem:[#allocation5 + $0x1cc] sm:$0xf]  ;;  %v3538_v54 = vld [vmem:[#allocation5 + $0x534] sm:$0xf0]  ;;  %v2775_v30 = vld [vmem:[#allocation5 + $0x3d8] sm:$0xf0] }
  0x8b   :  { %1460 = vmatpush.bf16.msrb.mxu1 %v2470_v56  ;;  %v2519_v56 = vld [vmem:[#allocation5 + $0x1d8] sm:$0xf0]  ;;  %v2950_v62 = vor.u32 %v3538_v54, %v2949_v52  ;;  %v3534_v1 = vld [vmem:[#allocation5 + $0x514] sm:$0xf0]  ;;  %v3452_v52 = vld [vmem:[#allocation5 + $0x28c] sm:$0xf] }
  0x8c   :  { %1473 = vmatpush.bf16.msrb.mxu2 %v2598_v57  ;;  %v2902_v57 = vor.u32 %v3526_v49, %v2901_v48  ;;  %v2522_v63 = vor.u32 %v3428_v55, %v2519_v56  ;;  %v3376_v55 = vld [vmem:[#allocation5 + $0x2c] sm:$0xf]  ;;  %v2311_v56 = vld [vmem:[#allocation5 + $0x38] sm:$0xf0] }
  0x8d   :  { %1486 = vmatpush.bf16.msrb.mxu3 %v2726_v61  ;;  %v3522_v61 = vld [vmem:[#allocation5 + $0x4b4] sm:$0xf0]  ;;  %v3484_v54 = vld [vmem:[#allocation5 + $0x38c] sm:$0xf] }
  0x8e   :  { %1448 = vmatpush.bf16.msrb.mxu0 %v2326_v3  ;;  %v3424_v3 = vld [vmem:[#allocation5 + $0x1ac] sm:$0xf] }
  0x8f   :  { %1461 = vmatpush.bf16.msrb.mxu1 %v2454_v4  ;;  %v2503_v4 = vld [vmem:[#allocation5 + $0x1b8] sm:$0xf0] }
  0x90   :  { %1474 = vmatpush.bf16.msrb.mxu2 %v2582_v5  ;;  %v2886_v5 = vor.u32 %v3522_v61, %v2885_v60  ;;  %v2506_v11 = vor.u32 %v3424_v3, %v2503_v4  ;;  %v2805_v60 = vld [vmem:[#allocation5 + $0x408] sm:$0xf]  ;;  %v3502_v61 = vld [vmem:[#allocation5 + $0x414] sm:$0xf0]  ;;  %v2295_v4 = vld [vmem:[#allocation5 + $0x18] sm:$0xf0] }
  0x91   :  { %1487 = vmatpush.bf16.msrb.mxu3 %v2710_v9  ;;  %v3518_v9 = vld [vmem:[#allocation5 + $0x494] sm:$0xf0] }
  0x92   :  { %1449 = vmatpush.bf16.msrb.mxu0 %v2310_v15  ;;  %v3420_v15 = vld [vmem:[#allocation5 + $0x18c] sm:$0xf]  ;;  %v2870_v17 = vor.u32 %v3518_v9, %v2869_v8  ;;  %v2663_v8 = vld [vmem:[#allocation5 + $0x2f8] sm:$0xf0] }
  0x93   :  { %1462 = vmatpush.bf16.msrb.mxu1 %v2438_v21  ;;  %v2998_v21 = vor.u32 %v3550_v12, %v2997_v10  ;;  %v3496_v9 = vld [vmem:[#allocation5 + $0x3ec] sm:$0xf]  ;;  %v2806_v10 = vor.u32 %v3502_v61, %v2805_v60 }
  0x94   :  { %1475 = vmatpush.bf16.msrb.mxu2 %v2566_v23  ;;  %v2362_v23 = vor.u32 %v3388_v13, %v2359_v14  ;;  %v3528_v12 = vld [vmem:[#allocation5 + $0x4ec] sm:$0xf]  ;;  %v2919_v13 = vld [vmem:[#allocation5 + $0x4f8] sm:$0xf0]  ;;  %v2934_v14 = vor.u32 %v3534_v1, %v2933_v0 }
  0x95   :  { %1488 = vmatpush.bf16.msrb.mxu3 %v2694_v27  ;;  %v2490_v27 = vor.u32 %v3420_v15, %v2487_v16  ;;  %v2298_v15 = vor.u32 %v3372_v2, %v2295_v4  ;;  %v3560_v16 = vld [vmem:[#allocation5 + $0x5ec] sm:$0xf]  ;;  %v2922_v25 = vor.u32 %v3528_v12, %v2919_v13  ;;  %v2727_v2 = vld [vmem:[#allocation5 + $0x378] sm:$0xf0] }
  0x96   :  { %1450 = vmatpush.bf16.msrb.mxu0 %v2294_v34  ;;  %v2982_v34 = vor.u32 %v3546_v28, %v2981_v26  ;;  %v3460_v26 = vld [vmem:[#allocation5 + $0x2cc] sm:$0xf]  ;;  %v2855_v4 = vld [vmem:[#allocation5 + $0x478] sm:$0xf0] }
  0x97   :  { %1463 = vmatpush.bf16.msrb.mxu1 %v2422_v40  ;;  %v2965_v40 = vld [vmem:[#allocation5 + $0x548] sm:$0xf]  ;;  %v3492_v28 = vld [vmem:[#allocation5 + $0x3cc] sm:$0xf] }
  0x98   :  { %1476 = vmatpush.bf16.msrb.mxu2 %v2550_v41  ;;  %v2474_v41 = vor.u32 %v3416_v31, %v2471_v32  ;;  %v2966_v48 = vor.u32 %v3542_v42, %v2965_v40  ;;  %v3524_v31 = vld [vmem:[#allocation5 + $0x4cc] sm:$0xf]  ;;  %v2903_v32 = vld [vmem:[#allocation5 + $0x4d8] sm:$0xf0] }
  0x99   :  { %1489 = vmatpush.bf16.msrb.mxu3 %v2678_v44  ;;  %1451 = vmatmul.bf16.vlgmr.msrb.gmra.mxu0 %v3877_v19  ;;  %v2327_v44 = vld [vmem:[#allocation5 + $0x58] sm:$0xf0]  ;;  %v3456_v40 = vld [vmem:[#allocation5 + $0x2ac] sm:$0xf] }
  0x9a   :  { %1495 = vmatpush.bf16.msra.mxu0 %v2918_v45  ;;  %1464 = vmatmul.bf16.vlgmr.msrb.gmra.mxu1 %v3881_v22  ;;  %v3412_v45 = vld [vmem:[#allocation5 + $0x14c] sm:$0xf]  ;;  %v2330_v49 = vor.u32 %v3380_v43, %v2327_v44  ;;  %v2759_v44 = vld [vmem:[#allocation5 + $0x3b8] sm:$0xf0] }
  0x9b   :  { %1508 = vmatpush.bf16.msra.mxu1 %v3046_v46  ;;  %1477 = vmatmul.bf16.vlgmr.msrb.gmra.mxu2 %v3875_v18  ;;  %v2455_v46 = vld [vmem:[#allocation5 + $0x158] sm:$0xf0]  ;;  %v3488_v42 = vld [vmem:[#allocation5 + $0x3ac] sm:$0xf] }
  0x9c   :  { %1521 = vmatpush.bf16.msra.mxu2 %v2410_v47  ;;  %1490 = vmatmul.bf16.vlgmr.msrb.gmra.mxu3 %v3879_v20  ;;  %v2838_v47 = vor.u32 %v3510_v39, %v2837_v37  ;;  %v2458_v53 = vor.u32 %v3412_v45, %v2455_v46  ;;  %v2778_v37 = vor.u32 %v3492_v28, %v2775_v30  ;;  %v3520_v45 = vld [vmem:[#allocation5 + $0x4ac] sm:$0xf]  ;;  %v2887_v46 = vld [vmem:[#allocation5 + $0x4b8] sm:$0xf0] }
  0x9d   :  { %1534 = vmatpush.bf16.msra.mxu3 %v2538_v51  ;;  %v3506_v51 = vld [vmem:[#allocation5 + $0x434] sm:$0xf0]  ;;  %v2906_v39 = vor.u32 %v3524_v31, %v2903_v32  ;;  %v3480_v0 = vld [vmem:[#allocation5 + $0x36c] sm:$0xf]  ;;  %v2567_v28 = vld [vmem:[#allocation5 + $0x238] sm:$0xf0] }
  0x9e   :  { %1496 = vmatpush.bf16.msra.mxu0 %v2902_v57  ;;  %v3408_v57 = vld [vmem:[#allocation5 + $0x12c] sm:$0xf]  ;;  %v2695_v32 = vld [vmem:[#allocation5 + $0x338] sm:$0xf0] }
  0x9f   :  { %1509 = vmatpush.bf16.msra.mxu1 %v3030_v58  ;;  %v2439_v58 = vld [vmem:[#allocation5 + $0x138] sm:$0xf0]  ;;  %v3476_v12 = vld [vmem:[#allocation5 + $0x34c] sm:$0xf] }
  0xa0   :  { %1522 = vmatpush.bf16.msra.mxu2 %v2394_v59  ;;  %v2822_v59 = vor.u32 %v3506_v51, %v2821_v50  ;;  %v2442_v3 = vor.u32 %v3408_v57, %v2439_v58  ;;  %v2762_v50 = vor.u32 %v3488_v42, %v2759_v44  ;;  %v2890_v51 = vor.u32 %v3520_v45, %v2887_v46  ;;  %v3516_v57 = vld [vmem:[#allocation5 + $0x48c] sm:$0xf]  ;;  %v2871_v58 = vld [vmem:[#allocation5 + $0x498] sm:$0xf0] }
  0xa1   :  { %1535 = vmatpush.bf16.msra.mxu3 %v2522_v63  ;;  %v2314_v63 = vor.u32 %v3376_v55, %v2311_v56  ;;  %v2743_v56 = vld [vmem:[#allocation5 + $0x398] sm:$0xf0]  ;;  %v3468_v44 = vld [vmem:[#allocation5 + $0x30c] sm:$0xf] }
  0xa2   :  { %1497 = vmatpush.bf16.msra.mxu0 %v2886_v5  ;;  %v3404_v5 = vld [vmem:[#allocation5 + $0x10c] sm:$0xf]  ;;  %v2746_v61 = vor.u32 %v3484_v54, %v2743_v56  ;;  %v2679_v45 = vld [vmem:[#allocation5 + $0x318] sm:$0xf0]  ;;  %v3913_v56 = vld [vmem:[#allocation7] sm:$0xf] }
  0xa3   :  { %1510 = vmatpush.bf16.msra.mxu1 %v3014_v6  ;;  %v2423_v6 = vld [vmem:[#allocation5 + $0x118] sm:$0xf0] }
  0xa4   :  { %1523 = vmatpush.bf16.msra.mxu2 %v2378_v7  ;;  %v3464_v7 = vld [vmem:[#allocation5 + $0x2ec] sm:$0xf]  ;;  %v3578_v54 = vld [vmem:[#allocation8 + $0x74] sm:$0xf0] }
  0xa5   :  { %1536 = vmatpush.bf16.msra.mxu3 %v2506_v11  ;;  %v2791_v11 = vld [vmem:[#allocation5 + $0x3f8] sm:$0xf0] }
  0xa6   :  { %1498 = vmatpush.bf16.msra.mxu0 %v2870_v17  ;;  %v3047_v17 = vld [vmem:[#allocation5 + $0x5f8] sm:$0xf0]  ;;  %v2794_v24 = vor.u32 %v3496_v9, %v2791_v11 }
  0xa7   :  { %1511 = vmatpush.bf16.msra.mxu1 %v2998_v21  ;;  %v2426_v21 = vor.u32 %v3404_v5, %v2423_v6  ;;  %v3050_v29 = vor.u32 %v3560_v16, %v3047_v17  ;;  %v3544_v5 = vld [vmem:[#allocation5 + $0x56c] sm:$0xf]  ;;  %v2983_v6 = vld [vmem:[#allocation5 + $0x578] sm:$0xf0] }
  0xa8   :  { %1524 = vmatpush.bf16.msra.mxu2 %v2362_v23  ;;  %v2666_v23 = vor.u32 %v3464_v7, %v2663_v8  ;;  %v2730_v8 = vor.u32 %v3480_v0, %v2727_v2  ;;  %v2583_v11 = vld [vmem:[#allocation5 + $0x258] sm:$0xf0]  ;;  %v2986_v13 = vor.u32 %v3544_v5, %v2983_v6  ;;  %v3540_v17 = vld [vmem:[#allocation5 + $0x54c] sm:$0xf]  ;;  %v3101_v0 = vld [vmem:[#allocation8 + $0x60] sm:$0xf] }
  0xa9   :  { %1537 = vmatpush.bf16.msra.mxu3 %v2490_v27  ;;  %v2647_v27 = vld [vmem:[#allocation5 + $0x2d8] sm:$0xf0] }
  0xaa   :  { %1499 = vmatpush.bf16.msra.mxu0 %v2854_v33  ;;  %v3556_v33 = vld [vmem:[#allocation5 + $0x5cc] sm:$0xf]  ;;  %v2839_v16 = vld [vmem:[#allocation5 + $0x458] sm:$0xf0] }
  0xab   :  { %1512 = vmatpush.bf16.msra.mxu1 %v2982_v34  ;;  %v3031_v34 = vld [vmem:[#allocation5 + $0x5d8] sm:$0xf0] }
  0xac   :  { %1525 = vmatpush.bf16.msra.mxu2 %v2346_v36  ;;  %v2650_v36 = vor.u32 %v3460_v26, %v2647_v27  ;;  %v3034_v43 = vor.u32 %v3556_v33, %v3031_v34  ;;  %v3440_v27 = vld [vmem:[#allocation5 + $0x22c] sm:$0xf]  ;;  %v2823_v34 = vld [vmem:[#allocation5 + $0x438] sm:$0xf0] }
  0xad   :  { %1538 = vmatpush.bf16.msra.mxu3 %v2474_v41  ;;  %v2631_v41 = vld [vmem:[#allocation5 + $0x2b8] sm:$0xf0]  ;;  %v3504_v33 = vld [vmem:[#allocation5 + $0x42c] sm:$0xf] }
  0xae   :  { %1500 = vmatpush.bf16.msra.mxu0 %v2838_v47  ;;  %v3552_v47 = vld [vmem:[#allocation5 + $0x5ac] sm:$0xf]  ;;  %v2826_v42 = vor.u32 %v3504_v33, %v2823_v34 }
  0xaf   :  { %1513 = vmatpush.bf16.msra.mxu1 %v2966_v48  ;;  %v3015_v48 = vld [vmem:[#allocation5 + $0x5b8] sm:$0xf0]  ;;  %v3568_v33 = vld [vmem:[#allocation8 + $0x24] sm:$0xf0] }
  0xb0   :  { %1526 = vmatpush.bf16.msra.mxu2 %v2330_v49  ;;  %v2634_v49 = vor.u32 %v3456_v40, %v2631_v41  ;;  %v3018_v55 = vor.u32 %v3552_v47, %v3015_v48  ;;  %v3436_v40 = vld [vmem:[#allocation5 + $0x20c] sm:$0xf] }
  0xb1   :  { %1539 = vmatpush.bf16.msra.mxu3 %v2458_v53  ;;  %v2615_v53 = vld [vmem:[#allocation5 + $0x298] sm:$0xf0]  ;;  %v3500_v48 = vld [vmem:[#allocation5 + $0x40c] sm:$0xf] }
  0xb2   :  { %1501 = vmatpush.bf16.msra.mxu0 %v2822_v59  ;;  %v3548_v59 = vld [vmem:[#allocation5 + $0x58c] sm:$0xf]  ;;  %v2618_v60 = vor.u32 %v3452_v52, %v2615_v53  ;;  %v2935_v52 = vld [vmem:[#allocation5 + $0x518] sm:$0xf0]  ;;  %v3109_v53 = vld [vmem:[#allocation8 + $0x70] sm:$0xf] }
  0xb3   :  { %1514 = vmatpush.bf16.msra.mxu1 %v2950_v62  ;;  %v3448_v62 = vld [vmem:[#allocation5 + $0x26c] sm:$0xf] }
  0xb4   :  { %1527 = vmatpush.bf16.msra.mxu2 %v2314_v63  ;;  %v2599_v63 = vld [vmem:[#allocation5 + $0x278] sm:$0xf0] }
  0xb5   :  { %1540 = vmatpush.bf16.msra.mxu3 %v2442_v3  ;;  %v3512_v3 = vld [vmem:[#allocation5 + $0x46c] sm:$0xf]  ;;  %v2602_v7 = vor.u32 %v3448_v62, %v2599_v63  ;;  %v3110_v62 = vor.u32 %v3578_v54, %v3109_v53  ;;  %v298_v63 = vperm.slane %v3913_v56, 0  ;;  %v3577_v54 = vld [vmem:[#allocation8 + $0x74] sm:$0xf] }
  0xb6   :  { %1502 = vmatpush.bf16.msra.mxu0 %v2806_v10  ;;  %v2858_v9 = vor.u32 %v3512_v3, %v2855_v4  ;;  %v3444_v10 = vld [vmem:[#allocation5 + $0x24c] sm:$0xf]  ;;  %v3165_v3 = vld [vmem:[#allocation8 + $0xe0] sm:$0xf] }
  0xb7   :  { %1515 = vmatpush.bf16.msra.mxu1 %v2934_v14  ;;  %v2711_v14 = vld [vmem:[#allocation5 + $0x358] sm:$0xf0]  ;;  %v3909_v30 = vpop.f32.mrf.mxu1  ;;  %v3592_v4 = vld [vmem:[#allocation8 + $0xe4] sm:$0xf0] }
  0xb8   :  { %1528 = vmatpush.bf16.msra.mxu2 %v2298_v15  ;;  %v3508_v15 = vld [vmem:[#allocation5 + $0x44c] sm:$0xf] }
  0xb9   :  { %1541 = vmatpush.bf16.msra.mxu3 %v2426_v21  ;;  %1503 = vmatmul.bf16.vlgmr.msra.gmra.mxu0 %v3887_v35  ;;  %v2967_v21 = vld [vmem:[#allocation5 + $0x558] sm:$0xf0]  ;;  %v2842_v26 = vor.u32 %v3508_v15, %v2839_v16  ;;  %v3085_v16 = vld [vmem:[#allocation8 + $0x40] sm:$0xf]  ;;  %v3564_v53 = vld [vmem:[#allocation8 + $0x4] sm:$0xf0] }
  0xba   :  { %1547 = vmatpush.bf16.msrb.mxu0 %v2666_v23  ;;  %1516 = vmatmul.bf16.vlgmr.msra.gmra.mxu1 %v3889_v38  ;;  %v2586_v23 = vor.u32 %v3444_v10, %v2583_v11  ;;  %v2970_v31 = vor.u32 %v3540_v17, %v2967_v21  ;;  %v3574_v10 = vld [vmem:[#allocation8 + $0x54] sm:$0xf0]  ;;  %v3166_v11 = vor.u32 %v3592_v4, %v3165_v3  ;;  %v3149_v21 = vld [vmem:[#allocation8 + $0xc0] sm:$0xf]  ;;  %v3103_v3 = vld [vmem:[#allocation8 + $0x68] sm:$0xf0] }
  0xbb   :  { %1560 = vmatpush.bf16.msrb.mxu1 %v2794_v24  ;;  %1529 = vmatmul.bf16.vlgmr.msra.gmra.mxu2 %v3877_v19  ;;  %v2999_v19 = vld [vmem:[#allocation5 + $0x598] sm:$0xf0]  ;;  %v3907_v24 = vpop.f32.mrf.mxu0 }
  0xbc   :  { %1573 = vmatpush.bf16.msrb.mxu2 %v2922_v25  ;;  %1542 = vmatmul.bf16.vlgmr.msra.gmra.mxu3 %v3881_v22  ;;  %v2874_v22 = vor.u32 %v3516_v57, %v2871_v58  ;;  %v3002_v1 = vor.u32 %v3548_v59, %v2999_v19  ;;  %v2714_v25 = vor.u32 %v3476_v12, %v2711_v14  ;;  %v3173_v58 = vld [vmem:[#allocation8 + $0xf0] sm:$0xf]  ;;  %v3594_v59 = vld [vmem:[#allocation8 + $0xf4] sm:$0xf0] }
  0xbd   :  { %1586 = vmatpush.bf16.msrb.mxu3 %v3050_v29  ;;  %v3472_v29 = vld [vmem:[#allocation5 + $0x32c] sm:$0xf]  ;;  %v2682_v19 = vor.u32 %v3468_v44, %v2679_v45  ;;  %v3174_v2 = vor.u32 %v3594_v59, %v3173_v58  ;;  %v3157_v12 = vld [vmem:[#allocation8 + $0xd0] sm:$0xf]  ;;  %v3117_v59 = vld [vmem:[#allocation8 + $0x80] sm:$0xf] }
  0xbe   :  { %1548 = vmatpush.bf16.msrb.mxu0 %v2650_v36  ;;  %v3536_v36 = vld [vmem:[#allocation5 + $0x52c] sm:$0xf]  ;;  %v2698_v41 = vor.u32 %v3472_v29, %v2695_v32  ;;  %v3586_v29 = vld [vmem:[#allocation8 + $0xb4] sm:$0xf0]  ;;  %v3069_v32 = vld [vmem:[#allocation8 + $0x20] sm:$0xf] }
  0xbf   :  { %1561 = vmatpush.bf16.msrb.mxu1 %v2778_v37  ;;  %v2951_v37 = vld [vmem:[#allocation5 + $0x538] sm:$0xf0]  ;;  %v3061_v45 = vld [vmem:[#allocation8 + $0x10] sm:$0xf] }
  0xc0   :  { %1574 = vmatpush.bf16.msrb.mxu2 %v2906_v39  ;;  %v2570_v39 = vor.u32 %v3440_v27, %v2567_v28  ;;  %v2954_v47 = vor.u32 %v3536_v36, %v2951_v37  ;;  %v3570_v27 = vld [vmem:[#allocation8 + $0x34] sm:$0xf0]  ;;  %v3133_v37 = vld [vmem:[#allocation8 + $0xa0] sm:$0xf] }
  0xc1   :  { %1587 = vmatpush.bf16.msrb.mxu3 %v3034_v43  ;;  %v2551_v43 = vld [vmem:[#allocation5 + $0x218] sm:$0xf0] }
  0xc2   :  { %1549 = vmatpush.bf16.msrb.mxu0 %v2634_v49  ;;  %v2807_v49 = vld [vmem:[#allocation5 + $0x418] sm:$0xf0] }
  0xc3   :  { %1562 = vmatpush.bf16.msrb.mxu1 %v2762_v50  ;;  %v3532_v50 = vld [vmem:[#allocation5 + $0x50c] sm:$0xf]  ;;  %v1298_v57 = vpop.f32.mrf.mxu0 }
  0xc4   :  { %1575 = vmatpush.bf16.msrb.mxu2 %v2890_v51  ;;  %v3111_v57 = vld [vmem:[#allocation8 + $0x78] sm:$0xf0] }
  0xc5   :  { %1588 = vmatpush.bf16.msrb.mxu3 %v3018_v55  ;;  %v1322_v46 = vpop.f32.mrf.mxu2  ;;  %v2554_v55 = vor.u32 %v3436_v40, %v2551_v43 }
  0xc6   :  { %1550 = vmatpush.bf16.msrb.mxu0 %v2618_v60  ;;  %v3911_v51 = vpop.f32.mrf.mxu3  ;;  %v2810_v60 = vor.u32 %v3500_v48, %v2807_v49  ;;  %v3125_v48 = vld [vmem:[#allocation8 + $0x90] sm:$0xf]  ;;  %v3582_v49 = vld [vmem:[#allocation8 + $0x94] sm:$0xf0] }
  0xc7   :  { %1563 = vmatpush.bf16.msrb.mxu1 %v2746_v61  ;;  %v1311_v61 = vpop.f32.mrf.mxu1 }
  0xc8   :  { %1576 = vmatpush.bf16.msrb.mxu2 %v2874_v22  ;;  %v2938_v22 = vor.u32 %v3532_v50, %v2935_v52  ;;  %v3053_v52 = vld [vmem:[#allocation8] sm:$0xf]  ;;  %v3593_v61 = vld [vmem:[#allocation8 + $0xf4] sm:$0xf] }
  0xc9   :  { %1589 = vmatpush.bf16.msrb.mxu3 %v3002_v1  ;;  %v3576_v1 = vld [vmem:[#allocation8 + $0x64] sm:$0xf0] }
  0xca   :  { %1551 = vmatpush.bf16.msrb.mxu0 %v2602_v7  ;;  %v3102_v6 = vor.u32 %v3576_v1, %v3101_v0  ;;  %v3114_v0 = vor.u32 %v3577_v54, %v3111_v57  ;;  %v3583_v54 = vld [vmem:[#allocation8 + $0xa4] sm:$0xf] }
  0xcb   :  { %1564 = vmatpush.bf16.msrb.mxu1 %v2730_v8  ;;  %v1297_v8 = vadd.f32 %v3907_v24, %v298_v63 }
  0xcc   :  { %1577 = vmatpush.bf16.msrb.mxu2 %v2858_v9  ;;  %v3093_v9 = vld [vmem:[#allocation8 + $0x50] sm:$0xf] }
  0xcd   :  { %1590 = vmatpush.bf16.msrb.mxu3 %v2986_v13  ;;  %v1324_v5 = vpop.f32.mrf.mxu2  ;;  %v3590_v13 = vld [vmem:[#allocation8 + $0xd4] sm:$0xf0]  ;;  %v3094_v14 = vor.u32 %v3574_v10, %v3093_v9  ;;  %v1310_v15 = vadd.f32 %v3909_v30, %v1297_v8  ;;  %v3237_v8 = vld [vmem:[#allocation8 + $0x170] sm:$0xf] }
  0xce   :  { %1552 = vmatpush.bf16.msrb.mxu0 %v2586_v23  ;;  %v1337_v7 = vpop.f32.mrf.mxu3  ;;  %v3158_v17 = vor.u32 %v3590_v13, %v3157_v12  ;;  %v3588_v23 = vld [vmem:[#allocation8 + $0xc4] sm:$0xf0]  ;;  %v299_v5 = vperm.slane %v3913_v56, 1  ;;  %v3610_v9 = vld [vmem:[#allocation8 + $0x174] sm:$0xf0] }
  0xcf   :  { %1565 = vmatpush.bf16.msrb.mxu1 %v2714_v25  ;;  %v3150_v28 = vor.u32 %v3588_v23, %v3149_v21  ;;  %v3167_v7 = vld [vmem:[#allocation8 + $0xe8] sm:$0xf0]  ;;  %v3238_v12 = vor.u32 %v3610_v9, %v3237_v8  ;;  %v3229_v13 = vld [vmem:[#allocation8 + $0x160] sm:$0xf]  ;;  %v3589_v21 = vld [vmem:[#allocation8 + $0xd4] sm:$0xf] }
  0xd0   :  { %1578 = vmatpush.bf16.msrb.mxu2 %v2842_v26  ;;  %v1323_v26 = vadd.f32 %v1322_v46, %v1310_v15  ;;  %v3566_v46 = vld [vmem:[#allocation8 + $0x14] sm:$0xf0]  ;;  %v3573_v15 = vld [vmem:[#allocation8 + $0x54] sm:$0xf]  ;;  %v3159_v23 = vld [vmem:[#allocation8 + $0xd8] sm:$0xf0] }
  0xd1   :  { %1591 = vmatpush.bf16.msrb.mxu3 %v2970_v31  ;;  %v3062_v50 = vor.u32 %v3566_v46, %v3061_v45  ;;  %v3143_v45 = vld [vmem:[#allocation8 + $0xb8] sm:$0xf0]  ;;  %v3598_v8 = vld [vmem:[#allocation8 + $0x114] sm:$0xf0] }
  0xd2   :  { %1553 = vmatpush.bf16.msrb.mxu0 %v2570_v39  ;;  %v1336_v30 = vadd.f32 %v3911_v51, %v1323_v26  ;;  %v3584_v39 = vld [vmem:[#allocation8 + $0xa4] sm:$0xf0] }
  0xd3   :  { %1566 = vmatpush.bf16.msrb.mxu1 %v2698_v41 }
  0xd4   :  { %1579 = vmatpush.bf16.msrb.mxu2 %v2826_v42  ;;  %v3070_v42 = vor.u32 %v3568_v33, %v3069_v32  ;;  %v3213_v32 = vld [vmem:[#allocation8 + $0x140] sm:$0xf]  ;;  %v3604_v33 = vld [vmem:[#allocation8 + $0x144] sm:$0xf0] }
  0xd5   :  { %1592 = vmatpush.bf16.msrb.mxu3 %v2954_v47  ;;  %v3134_v47 = vor.u32 %v3584_v39, %v3133_v37  ;;  %v3569_v37 = vld [vmem:[#allocation8 + $0x34] sm:$0xf]  ;;  %v3079_v39 = vld [vmem:[#allocation8 + $0x38] sm:$0xf0]  ;;  %v3214_v46 = vor.u32 %v3604_v33, %v3213_v32  ;;  %v3626_v32 = vld [vmem:[#allocation8 + $0x1f4] sm:$0xf0] }
  0xd6   :  { %1554 = vmatpush.bf16.msrb.mxu0 %v2554_v55  ;;  %v1348_v24 = vpop.f32.mrf.mxu0  ;;  %v3126_v55 = vor.u32 %v3582_v49, %v3125_v48  ;;  %v3082_v49 = vor.u32 %v3569_v37, %v3079_v39 }
  0xd7   :  { %1567 = vmatpush.bf16.msrb.mxu1 %v2682_v19  ;;  %v1349_v44 = vadd.f32 %v1348_v24, %v1336_v30  ;;  %v3580_v19 = vld [vmem:[#allocation8 + $0x84] sm:$0xf0] }
  0xd8   :  { %1580 = vmatpush.bf16.msrb.mxu2 %v2810_v60  ;;  %v3118_v1 = vor.u32 %v3580_v19, %v3117_v59  ;;  %v3197_v19 = vld [vmem:[#allocation8 + $0x120] sm:$0xf] }
  0xd9   :  { %1593 = vmatpush.bf16.msrb.mxu3 %v2938_v22  ;;  %1555 = vmatmul.bf16.vlgmr.msrb.gmra.mxu0 %v3875_v18  ;;  %v3572_v18 = vld [vmem:[#allocation8 + $0x44] sm:$0xf0]  ;;  %v3175_v22 = vld [vmem:[#allocation8 + $0xf8] sm:$0xf0] }
  0xda   :  { %1997 = vmatpush.bf16.msra.mxu0 %v3110_v62  ;;  %1568 = vmatmul.bf16.vlgmr.msrb.gmra.mxu1 %v3879_v20  ;;  %v3086_v25 = vor.u32 %v3572_v18, %v3085_v16  ;;  %v1361_v20 = vpop.f32.mrf.mxu1  ;;  %v3054_v62 = vor.u32 %v3564_v53, %v3053_v52  ;;  %v3178_v4 = vor.u32 %v3593_v61, %v3175_v22  ;;  %v3095_v16 = vld [vmem:[#allocation8 + $0x58] sm:$0xf0] }
  0xdb   :  { %2010 = vmatpush.bf16.msra.mxu1 %v3174_v2  ;;  %1581 = vmatmul.bf16.vlgmr.msrb.gmra.mxu2 %v3887_v35  ;;  %v3077_v35 = vld [vmem:[#allocation8 + $0x30] sm:$0xf]  ;;  %v1362_v51 = vadd.f32 %v1361_v20, %v1349_v44  ;;  %v3575_v2 = vld [vmem:[#allocation8 + $0x64] sm:$0xf]  ;;  %v3606_v20 = vld [vmem:[#allocation8 + $0x154] sm:$0xf0]  ;;  %v3098_v26 = vor.u32 %v3573_v15, %v3095_v16 }
  0xdc   :  { %1594 = vmatmul.bf16.vlgmr.msrb.gmra.mxu3 %v3889_v38  ;;  %v3141_v38 = vld [vmem:[#allocation8 + $0xb0] sm:$0xf]  ;;  %v3078_v31 = vor.u32 %v3570_v27, %v3077_v35  ;;  %2023 = vmatpush.bf16.msra.mxu2 %v3238_v12  ;;  %v3571_v35 = vld [vmem:[#allocation8 + $0x44] sm:$0xf]  ;;  %v3087_v27 = vld [vmem:[#allocation8 + $0x48] sm:$0xf0] }
  0xdd   :  { %v3142_v34 = vor.u32 %v3586_v29, %v3141_v38  ;;  %v1599_v63 = vmax.f32 %v1362_v51, 0.0  ;;  %v3587_v29 = vld [vmem:[#allocation8 + $0xc4] sm:$0xf]  ;;  %v3585_v44 = vld [vmem:[#allocation8 + $0xb4] sm:$0xf] }
  0xde   :  { %1998 = vmatpush.bf16.msra.mxu0 %v3102_v6  ;;  %v1374_v36 = vpop.f32.mrf.mxu2  ;;  %v1350_v41 = vpop.f32.mrf.mxu0  ;;  %v3591_v6 = vld [vmem:[#allocation8 + $0xe4] sm:$0xf]  ;;  %v3071_v51 = vld [vmem:[#allocation8 + $0x28] sm:$0xf0]  ;;  %v3146_v52 = vor.u32 %v3585_v44, %v3143_v45 }
  0xdf   :  { %2011 = vmatpush.bf16.msra.mxu1 %v3166_v11  ;;  %v3923_v40 = vpop.f32.mrf.mxu3  ;;  %v3926_v10 = vpack.c.bf16 %v1599_v63, %v1599_v63  ;;  %v3106_v11 = vor.u32 %v3575_v2, %v3103_v3  ;;  %v3170_v18 = vor.u32 %v3591_v6, %v3167_v7  ;;  %v3063_v63 = vld [vmem:[#allocation8 + $0x18] sm:$0xf0]  ;;  %v3581_v2 = vld [vmem:[#allocation8 + $0x94] sm:$0xf]  ;;  %v3189_v7 = vld [vmem:[#allocation8 + $0x110] sm:$0xf] }
  0xe0   :  { %v3127_v3 = vld [vmem:[#allocation8 + $0x98] sm:$0xf0]  ;;  %v3563_v12 = vld [vmem:[#allocation8 + $0x4] sm:$0xf]  ;;  %v3119_v16 = vld [vmem:[#allocation8 + $0x88] sm:$0xf0] }
  0xe1   :  { %v3579_v15 = vld [vmem:[#allocation8 + $0x84] sm:$0xf] }
  0xe2   :  { %1999 = vmatpush.bf16.msra.mxu0 %v3094_v14  ;;  %v1363_v43 = vpop.f32.mrf.mxu1  ;;  %v3608_v14 = vld [vmem:[#allocation8 + $0x164] sm:$0xf0]  ;;  %v3603_v45 = vld [vmem:[#allocation8 + $0x144] sm:$0xf] }
  0xe3   :  { %2012 = vmatpush.bf16.msra.mxu1 %v3158_v17  ;;  %v1375_v17 = vadd.f32 %v1374_v36, %v299_v5  ;;  %v3230_v24 = vor.u32 %v3608_v14, %v3229_v13  ;;  %v3055_v13 = vld [vmem:[#allocation8 + $0x8] sm:$0xf0]  ;;  %v3130_v14 = vor.u32 %v3581_v2, %v3127_v3  ;;  %v3261_v3 = vld [vmem:[#allocation8 + $0x1a0] sm:$0xf] }
  0xe5   :  { %v1388_v38 = vadd.f32 %v3923_v40, %v1375_v17  ;;  %2024 = vmatpush.bf16.msra.mxu2 %v3230_v24  ;;  %v3205_v40 = vld [vmem:[#allocation8 + $0x130] sm:$0xf]  ;;  %v3190_v17 = vor.u32 %v3598_v8, %v3189_v7  ;;  %v3596_v24 = vld [vmem:[#allocation8 + $0x104] sm:$0xf0]  ;;  %v3595_v8 = vld [vmem:[#allocation8 + $0x104] sm:$0xf] }
  0xe6   :  { %2000 = vmatpush.bf16.msra.mxu0 %v3086_v25  ;;  %v1376_v58 = vpop.f32.mrf.mxu2  ;;  %v3221_v25 = vld [vmem:[#allocation8 + $0x150] sm:$0xf] }
  0xe7   :  { %2013 = vmatpush.bf16.msra.mxu1 %v3150_v28  ;;  %v1389_v60 = vpop.f32.mrf.mxu3  ;;  %v3162_v28 = vor.u32 %v3589_v21, %v3159_v23  ;;  %v3222_v30 = vor.u32 %v3606_v20, %v3221_v25  ;;  %v3181_v23 = vld [vmem:[#allocation8 + $0x100] sm:$0xf]  ;;  %v3058_v25 = vor.u32 %v3563_v12, %v3055_v13  ;;  %v3609_v20 = vld [vmem:[#allocation8 + $0x174] sm:$0xf]  ;;  %v3253_v13 = vld [vmem:[#allocation8 + $0x190] sm:$0xf] }
  0xe8   :  { %v3600_v60 = vld [vmem:[#allocation8 + $0x124] sm:$0xf0] }
  0xe9   :  { %2025 = vmatpush.bf16.msra.mxu2 %v3222_v30  ;;  %v3198_v5 = vor.u32 %v3600_v60, %v3197_v19  ;;  %v3301_v30 = vld [vmem:[#allocation8 + $0x1f0] sm:$0xf]  ;;  %v3199_v60 = vld [vmem:[#allocation8 + $0x128] sm:$0xf0] }
  0xea   :  { %2001 = vmatpush.bf16.msra.mxu0 %v3078_v31  ;;  %v3151_v31 = vld [vmem:[#allocation8 + $0xc8] sm:$0xf0]  ;;  %v3302_v33 = vor.u32 %v3626_v32, %v3301_v30 }
  0xeb   :  { %2014 = vmatpush.bf16.msra.mxu1 %v3142_v34  ;;  %v3090_v34 = vor.u32 %v3571_v35, %v3087_v27  ;;  %v3154_v41 = vor.u32 %v3587_v29, %v3151_v31  ;;  %v3122_v35 = vor.u32 %v3579_v15, %v3119_v16  ;;  %v3182_v27 = vor.u32 %v3596_v24, %v3181_v23  ;;  %v3231_v29 = vld [vmem:[#allocation8 + $0x168] sm:$0xf0]  ;;  %v3612_v23 = vld [vmem:[#allocation8 + $0x184] sm:$0xf0] }
  0xec   :  { %2036 = vmatpush.bf16.msra.mxu3 %v3302_v33  ;;  %v3621_v33 = vld [vmem:[#allocation8 + $0x1d4] sm:$0xf] }
  0xed   :  { %2026 = vmatpush.bf16.msra.mxu2 %v3214_v46  ;;  %v3215_v46 = vld [vmem:[#allocation8 + $0x148] sm:$0xf0] }
  0xee   :  { %2002 = vmatpush.bf16.msra.mxu0 %v3070_v42 }
  0xef   :  { %2015 = vmatpush.bf16.msra.mxu1 %v3134_v47  ;;  %v3602_v47 = vld [vmem:[#allocation8 + $0x134] sm:$0xf0] }
  0xf0   :  { %v3206_v57 = vor.u32 %v3602_v47, %v3205_v40  ;;  %v3285_v40 = vld [vmem:[#allocation8 + $0x1d0] sm:$0xf]  ;;  %v3622_v47 = vld [vmem:[#allocation8 + $0x1d4] sm:$0xf0] }
  0xf2   :  { %2003 = vmatpush.bf16.msra.mxu0 %v3062_v50  ;;  %v3567_v50 = vld [vmem:[#allocation8 + $0x24] sm:$0xf]  ;;  %2027 = vmatpush.bf16.msra.mxu2 %v3206_v57  ;;  %v3620_v57 = vld [vmem:[#allocation8 + $0x1c4] sm:$0xf0] }
  0xf3   :  { %2016 = vmatpush.bf16.msra.mxu1 %v3126_v55  ;;  %v3135_v55 = vld [vmem:[#allocation8 + $0xa8] sm:$0xf0]  ;;  %v3074_v61 = vor.u32 %v3567_v50, %v3071_v51  ;;  %v3601_v50 = vld [vmem:[#allocation8 + $0x134] sm:$0xf]  ;;  %v3207_v51 = vld [vmem:[#allocation8 + $0x138] sm:$0xf0] }
  0xf6   :  { %2004 = vmatpush.bf16.msra.mxu0 %v3054_v62  ;;  %v1400_v36 = vpop.f32.mrf.mxu0  ;;  %v3565_v62 = vld [vmem:[#allocation8 + $0x14] sm:$0xf]  ;;  %2028 = vmatpush.bf16.msra.mxu2 %v3198_v5 }
  0xf7   :  { %2017 = vmatpush.bf16.msra.mxu1 %v3118_v1  ;;  %v1401_v42 = vadd.f32 %v1400_v36, %v1388_v38  ;;  %v1413_v43 = vpop.f32.mrf.mxu1  ;;  %v3066_v9 = vor.u32 %v3565_v62, %v3063_v63  ;;  %v3607_v38 = vld [vmem:[#allocation8 + $0x164] sm:$0xf]  ;;  %v3223_v36 = vld [vmem:[#allocation8 + $0x158] sm:$0xf0]  ;;  %v300_v63 = vperm.slane %v3913_v56, 2 }
  0xf8   :  { %v3234_v31 = vor.u32 %v3607_v38, %v3231_v29  ;;  %v3295_v38 = vld [vmem:[#allocation8 + $0x1e8] sm:$0xf0] }
  0xf9   :  { %2005 = vmatmul.bf16.vlgmr.msra.gmra.mxu0 %v3926_v10  ;;  %v1414_v48 = vadd.f32 %v1413_v43, %v1401_v42  ;;  %v3293_v42 = vld [vmem:[#allocation8 + $0x1e0] sm:$0xf]  ;;  %v3624_v43 = vld [vmem:[#allocation8 + $0x1e4] sm:$0xf0] }
  0xfa   :  { %2049 = vmatpush.bf16.msrb.mxu0 %v3114_v0  ;;  %v3138_v0 = vor.u32 %v3583_v54, %v3135_v55  ;;  %2029 = vmatpush.bf16.msra.mxu2 %v3190_v17  ;;  %v3294_v44 = vor.u32 %v3624_v43, %v3293_v42  ;;  %v3210_v54 = vor.u32 %v3601_v50, %v3207_v51  ;;  %v3277_v55 = vld [vmem:[#allocation8 + $0x1c0] sm:$0xf]  ;;  %v3263_v50 = vld [vmem:[#allocation8 + $0x1a8] sm:$0xf0] }
  0xfb   :  { %2062 = vmatpush.bf16.msrb.mxu1 %v3178_v4  ;;  %v3278_v19 = vor.u32 %v3620_v57, %v3277_v55  ;;  %v3255_v55 = vld [vmem:[#allocation8 + $0x198] sm:$0xf0] }
  0xfc   :  { %2037 = vmatpush.bf16.msra.mxu3 %v3294_v44  ;;  %v3619_v44 = vld [vmem:[#allocation8 + $0x1c4] sm:$0xf] }
  0xfe   :  { %2050 = vmatpush.bf16.msrb.mxu0 %v3106_v11  ;;  %v1426_v53 = vpop.f32.mrf.mxu2  ;;  %v1402_v1 = vpop.f32.mrf.mxu0  ;;  %2030 = vmatpush.bf16.msra.mxu2 %v3182_v27 }
  0xff   :  { %2063 = vmatpush.bf16.msrb.mxu1 %v3170_v18  ;;  %v1427_v58 = vadd.f32 %v1426_v53, %v1414_v48  ;;  %v1439_v59 = vpop.f32.mrf.mxu3  ;;  %v1415_v4 = vpop.f32.mrf.mxu1  ;;  %v3286_v48 = vor.u32 %v3622_v47, %v3285_v40  ;;  %v3191_v1 = vld [vmem:[#allocation8 + $0x118] sm:$0xf0]  ;;  %v3617_v40 = vld [vmem:[#allocation8 + $0x1b4] sm:$0xf] }
 0x100   :  { %v3616_v4 = vld [vmem:[#allocation8 + $0x1a4] sm:$0xf0]  ;;  %v3271_v47 = vld [vmem:[#allocation8 + $0x1b8] sm:$0xf0] }
 0x101   :  { %v1440_v22 = vadd.f32 %v1439_v59, %v1427_v58  ;;  %2038 = vmatpush.bf16.msra.mxu3 %v3286_v48  ;;  %v3599_v58 = vld [vmem:[#allocation8 + $0x124] sm:$0xf]  ;;  %v3262_v12 = vor.u32 %v3616_v4, %v3261_v3  ;;  %v3274_v48 = vor.u32 %v3617_v40, %v3271_v47 }
 0x102   :  { %2051 = vmatpush.bf16.msrb.mxu0 %v3098_v26  ;;  %v3239_v26 = vld [vmem:[#allocation8 + $0x178] sm:$0xf0]  ;;  %v3202_v62 = vor.u32 %v3599_v58, %v3199_v60  ;;  %v3611_v58 = vld [vmem:[#allocation8 + $0x184] sm:$0xf] }
 0x103   :  { %2064 = vmatpush.bf16.msrb.mxu1 %v3162_v28  ;;  %v1600_v6 = vmax.f32 %v1440_v22, 0.0  ;;  %v3242_v28 = vor.u32 %v3609_v20, %v3239_v26  ;;  %v3618_v22 = vld [vmem:[#allocation8 + $0x1b4] sm:$0xf0]  ;;  %v3303_v20 = vld [vmem:[#allocation8 + $0x1f8] sm:$0xf0]  ;;  %v3635_v40 = vld [vmem:[#allocation10 + $0x40] sm:$0xff] }
 0x105   :  { %v1604_v11 = vpack.c.bf16 %v1600_v6, %v1600_v6  ;;  %2075 = vmatpush.bf16.msrb.mxu2 %v3242_v28  ;;  %2039 = vmatpush.bf16.msra.mxu3 %v3278_v19  ;;  %v3623_v28 = vld [vmem:[#allocation8 + $0x1e4] sm:$0xf]  ;;  %v301_v19 = vperm.slane %v3913_v56, 3 }
 0x106   :  { %2052 = vmatpush.bf16.msrb.mxu0 %v3090_v34  ;;  %v1428_v18 = vpop.f32.mrf.mxu2  ;;  %v3605_v34 = vld [vmem:[#allocation8 + $0x154] sm:$0xf]  ;;  %v3298_v30 = vor.u32 %v3623_v28, %v3295_v38  ;;  %v3634_v28 = vld [vmem:[#allocation10 + $0x38] sm:$0xff] }
 0x107   :  { %2065 = vmatpush.bf16.msrb.mxu1 %v3154_v41  ;;  %v1441_v21 = vpop.f32.mrf.mxu3  ;;  %v3226_v39 = vor.u32 %v3605_v34, %v3223_v36  ;;  %v3287_v34 = vld [vmem:[#allocation8 + $0x1d8] sm:$0xf0]  ;;  %v3633_v38 = vld [vmem:[#allocation10 + $0x30] sm:$0xff] }
 0x108   :  { %2018 = vmatmul.bf16.vlgmr.msra.gmra.mxu1 %v1604_v11  ;;  %v3245_v21 = vld [vmem:[#allocation8 + $0x180] sm:$0xf] }
 0x109   :  { %2076 = vmatpush.bf16.msrb.mxu2 %v3234_v31  ;;  %v3246_v24 = vor.u32 %v3612_v23, %v3245_v21 }
 0x10a   :  { %2053 = vmatpush.bf16.msrb.mxu0 %v3082_v49 }
 0x10b   :  { %2066 = vmatpush.bf16.msrb.mxu1 %v3146_v52 }
 0x10d   :  { %2077 = vmatpush.bf16.msrb.mxu2 %v3226_v39 }
 0x10e   :  { %2054 = vmatpush.bf16.msrb.mxu0 %v3074_v61  ;;  %v3269_v61 = vld [vmem:[#allocation8 + $0x1b0] sm:$0xf] }
 0x10f   :  { %2067 = vmatpush.bf16.msrb.mxu1 %v3138_v0  ;;  %v3597_v0 = vld [vmem:[#allocation8 + $0x114] sm:$0xf]  ;;  %v3270_v2 = vor.u32 %v3618_v22, %v3269_v61 }
 0x110   :  { %v3194_v5 = vor.u32 %v3597_v0, %v3191_v1 }
 0x111   :  { %2040 = vmatpush.bf16.msra.mxu3 %v3270_v2 }
 0x112   :  { %2055 = vmatpush.bf16.msrb.mxu0 %v3066_v9  ;;  %v3183_v9 = vld [vmem:[#allocation8 + $0x108] sm:$0xf0] }
 0x113   :  { %2068 = vmatpush.bf16.msrb.mxu1 %v3130_v14  ;;  %v3614_v14 = vld [vmem:[#allocation8 + $0x194] sm:$0xf0]  ;;  %v3186_v15 = vor.u32 %v3595_v8, %v3183_v9 }
 0x114   :  { %v3254_v18 = vor.u32 %v3614_v14, %v3253_v13  ;;  %v1671_v14 = vld [vmem:[%s3946_s4] sm:$0x3] }
 0x115   :  { %2041 = vmatpush.bf16.msra.mxu3 %v3262_v12 }
 0x116   :  { %2056 = vmatpush.bf16.msrb.mxu0 %v3058_v25  ;;  %v1452_v37 = vpop.f32.mrf.mxu0  ;;  %v3625_v25 = vld [vmem:[#allocation8 + $0x1f4] sm:$0xf] }
 0x117   :  { %2069 = vmatpush.bf16.msrb.mxu1 %v3122_v35  ;;  %v1465_v41 = vpop.f32.mrf.mxu1  ;;  %v1453_v6 = vadd.f32 %v1452_v37, %v300_v63  ;;  %v3306_v35 = vor.u32 %v3625_v25, %v3303_v20  ;;  %v3290_v37 = vor.u32 %v3621_v33, %v3287_v34  ;;  %v3641_v33 = vld [vmem:[#allocation10 + $0x70] sm:$0xff] }
 0x118   :  { %v3629_v34 = vld [vmem:[#allocation10 + $0x10] sm:$0xff] }
 0x119   :  { %2057 = vmatmul.bf16.vlgmr.msrb.gmra.mxu0 %v3926_v10  ;;  %v3218_v10 = vor.u32 %v3603_v45, %v3215_v46  ;;  %v1466_v16 = vadd.f32 %v1465_v41, %v1453_v6  ;;  %2042 = vmatpush.bf16.msra.mxu3 %v3254_v18  ;;  %v3279_v45 = vld [vmem:[#allocation8 + $0x1c8] sm:$0xf0] }
 0x11a   :  { %2070 = vmatmul.bf16.vlgmr.msrb.gmra.mxu1 %v1604_v11  ;;  %2237 = vmatpush.bf16.msra.mxu0 %v3634_v28 }
 0x11b   :  { %2078 = vmatpush.bf16.msrb.mxu2 %v3218_v10  ;;  %v3282_v10 = vor.u32 %v3619_v44, %v3279_v45  ;;  %v3638_v44 = vld [vmem:[#allocation10 + $0x58] sm:$0xff]  ;;  %v3637_v45 = vld [vmem:[#allocation10 + $0x50] sm:$0xff] }
 0x11d   :  { %2043 = vmatpush.bf16.msra.mxu3 %v3246_v24  ;;  %v1674_v24 = vperm.slane %v1671_v14, 1 }
 0x11e   :  { %v1478_v49 = vpop.f32.mrf.mxu2  ;;  %v1454_v52 = vpop.f32.mrf.mxu0  ;;  %2238 = vmatpush.bf16.msra.mxu0 %v3633_v38 }
 0x11f   :  { %v1491_v53 = vpop.f32.mrf.mxu3  ;;  %v1467_v59 = vpop.f32.mrf.mxu1  ;;  %2079 = vmatpush.bf16.msrb.mxu2 %v3210_v54  ;;  %v1479_v17 = vadd.f32 %v1478_v49, %v1466_v16  ;;  %v3615_v49 = vld [vmem:[#allocation8 + $0x1a4] sm:$0xf]  ;;  %v3613_v54 = vld [vmem:[#allocation8 + $0x194] sm:$0xf] }
 0x120   :  { %v3266_v52 = vor.u32 %v3615_v49, %v3263_v50  ;;  %v3258_v57 = vor.u32 %v3613_v54, %v3255_v55  ;;  %v3247_v59 = vld [vmem:[#allocation8 + $0x188] sm:$0xf0] }
 0x121   :  { %v1492_v26 = vadd.f32 %v1491_v53, %v1479_v17  ;;  %2088 = vmatpush.bf16.msrb.mxu3 %v3306_v35  ;;  %v3250_v60 = vor.u32 %v3611_v58, %v3247_v59 }
 0x123   :  { %2080 = vmatpush.bf16.msrb.mxu2 %v3202_v62 }
 0x125   :  { %2089 = vmatpush.bf16.msrb.mxu3 %v3298_v30  ;;  %v3630_v30 = vld [vmem:[#allocation10 + $0x18] sm:$0xff] }
 0x126   :  { %v1480_v7 = vpop.f32.mrf.mxu2 }
 0x127   :  { %v1493_v11 = vpop.f32.mrf.mxu3  ;;  %2081 = vmatpush.bf16.msrb.mxu2 %v3194_v5 }
 0x129   :  { %2090 = vmatpush.bf16.msrb.mxu3 %v3290_v37  ;;  %v3628_v37 = vld [vmem:[#allocation10 + $0x8] sm:$0xff] }
 0x12b   :  { %2082 = vmatpush.bf16.msrb.mxu2 %v3186_v15  ;;  %v1673_v15 = vperm.slane %v1671_v14, 0 }
 0x12d   :  { %2091 = vmatpush.bf16.msrb.mxu3 %v3282_v10  ;;  %v3636_v10 = vld [vmem:[#allocation10 + $0x48] sm:$0xff] }
 0x131   :  { %2092 = vmatpush.bf16.msrb.mxu3 %v3274_v48 }
 0x135   :  { %2093 = vmatpush.bf16.msrb.mxu3 %v3266_v52 }
 0x136   :  { %v1504_v27 = vpop.f32.mrf.mxu0 }
 0x137   :  { %v1505_v29 = vadd.f32 %v1504_v27, %v1492_v26  ;;  %v1517_v31 = vpop.f32.mrf.mxu1 }
 0x139   :  { %v1518_v32 = vadd.f32 %v1517_v31, %v1505_v29  ;;  %2094 = vmatpush.bf16.msrb.mxu3 %v3258_v57  ;;  %v3632_v29 = vld [vmem:[#allocation10 + $0x28] sm:$0xff]  ;;  %v3631_v31 = vld [vmem:[#allocation10 + $0x20] sm:$0xff] }
 0x13a   :  { %2239 = vmatpush.bf16.msra.mxu0 %v3632_v29 }
 0x13b   :  { %v1601_v36 = vmax.f32 %v1518_v32, 0.0  ;;  %v3642_v32 = vld [vmem:[#allocation10 + $0x78] sm:$0xff] }
 0x13c   :  { %2250 = vmatpush.bf16.msra.mxu1 %v3642_v32 }
 0x13d   :  { %v1605_v39 = vpack.c.bf16 %v1601_v36, %v1601_v36  ;;  %2095 = vmatpush.bf16.msrb.mxu3 %v3250_v60 }
 0x13e   :  { %v1530_v41 = vpop.f32.mrf.mxu2  ;;  %v1506_v43 = vpop.f32.mrf.mxu0  ;;  %2240 = vmatpush.bf16.msra.mxu0 %v3631_v31 }
 0x13f   :  { %v1543_v42 = vpop.f32.mrf.mxu3  ;;  %2031 = vmatmul.bf16.vlgmr.msra.gmra.mxu2 %v1605_v39  ;;  %v1519_v46 = vpop.f32.mrf.mxu1  ;;  %v1531_v61 = vadd.f32 %v1530_v41, %v301_v19  ;;  %v3627_v41 = vld [vmem:[#allocation10] sm:$0xff] }
 0x140   :  { %2251 = vmatpush.bf16.msra.mxu1 %v3641_v33 }
 0x141   :  { %v1544_v22 = vadd.f32 %v1543_v42, %v1531_v61  ;;  %v3639_v42 = vld [vmem:[#allocation10 + $0x60] sm:$0xff] }
 0x142   :  { %2241 = vmatpush.bf16.msra.mxu0 %v3630_v30 }
 0x146   :  { %v1532_v51 = vpop.f32.mrf.mxu2  ;;  %2242 = vmatpush.bf16.msra.mxu0 %v3629_v34 }
 0x147   :  { %v1545_v53 = vpop.f32.mrf.mxu3 }
 0x14a   :  { %2243 = vmatpush.bf16.msra.mxu0 %v3628_v37 }
 0x14e   :  { %2244 = vmatpush.bf16.msra.mxu0 %v3627_v41 }
 0x14f   :  { %2083 = vmatmul.bf16.vlgmr.msrb.gmra.mxu2 %v1605_v39  ;;  %v3640_v39 = vld [vmem:[#allocation10 + $0x68] sm:$0xff] }
 0x150   :  { %2252 = vmatpush.bf16.msra.mxu1 %v3640_v39 }
 0x154   :  { %2253 = vmatpush.bf16.msra.mxu1 %v3639_v42 }
 0x156   :  { %v1556_v62 = vpop.f32.mrf.mxu0 }
 0x157   :  { %v1569_v63 = vpop.f32.mrf.mxu1  ;;  %v1557_v0 = vadd.f32 %v1556_v62, %v1544_v22  ;;  %v3655_v22 = vld [vmem:[%s3948_s6] ss:$0 sm:$0xff] }
 0x158   :  { %2254 = vmatpush.bf16.msra.mxu1 %v3638_v44 }
 0x159   :  { %v1570_v1 = vadd.f32 %v1569_v63, %v1557_v0 }
 0x15c   :  { %2255 = vmatpush.bf16.msra.mxu1 %v3637_v45 }
 0x15e   :  { %v1582_v2 = vpop.f32.mrf.mxu2  ;;  %v1558_v5 = vpop.f32.mrf.mxu0 }
 0x15f   :  { %v1583_v3 = vadd.f32 %v1582_v2, %v1570_v1  ;;  %v1595_v4 = vpop.f32.mrf.mxu3  ;;  %v1571_v6 = vpop.f32.mrf.mxu1 }
 0x160   :  { %2256 = vmatpush.bf16.msra.mxu1 %v3636_v10 }
 0x161   :  { %v1596_v7 = vadd.f32 %v1595_v4, %v1583_v3 }
 0x163   :  { %v1602_v8 = vmax.f32 %v1596_v7, 0.0 }
 0x164   :  { %2257 = vmatpush.bf16.msra.mxu1 %v3635_v40 }
 0x165   :  { %v1606_v9 = vpack.c.bf16 %v1602_v8, %v1602_v8 }
 0x166   :  { %v1584_v11 = vpop.f32.mrf.mxu2 }
 0x167   :  { %v1597_v56 = vpop.f32.mrf.mxu3  ;;  %2044 = vmatmul.bf16.vlgmr.msra.gmra.mxu3 %v1606_v9 }
 0x176   :  { %v2006_v12 = vpop.f32.mrf.mxu0 }
 0x177   :  { %2096 = vmatmul.bf16.vlgmr.msrb.gmra.mxu3 %v1606_v9  ;;  %v2007_v16 = vadd.f32 %v2006_v12, %v1673_v15 }
 0x17e   :  { %v2008_v13 = vpop.f32.mrf.mxu0 }
 0x185   :  { %v2019_v18 = vpop.f32.mrf.mxu1 }
 0x186   :  { %v2020_v17 = vadd.f32 %v2019_v18, %v2007_v16 }
 0x18d   :  { %v2021_v23 = vpop.f32.mrf.mxu1 }
 0x196   :  { %v2058_v21 = vpop.f32.mrf.mxu0 }
 0x197   :  { %v2059_v25 = vadd.f32 %v2058_v21, %v1674_v24  ;;  %v2071_v26 = vpop.f32.mrf.mxu1 }
 0x199   :  { %v2072_v35 = vadd.f32 %v2071_v26, %v2059_v25 }
 0x19e   :  { %v2060_v20 = vpop.f32.mrf.mxu0 }
 0x19f   :  { %v2073_v27 = vpop.f32.mrf.mxu1 }
 0x1c2   :  { %v2032_v36 = vpop.f32.mrf.mxu2 }
 0x1c3   :  { %v2033_v48 = vadd.f32 %v2032_v36, %v2020_v17 }
 0x1ca   :  { %v2034_v43 = vpop.f32.mrf.mxu2 }
 0x1d2   :  { %v2084_v46 = vpop.f32.mrf.mxu2 }
 0x1d3   :  { %v2085_v54 = vadd.f32 %v2084_v46, %v2072_v35 }
 0x1da   :  { %v2086_v47 = vpop.f32.mrf.mxu2 }
 0x1ea   :  { %v2045_v49 = vpop.f32.mrf.mxu3 }
 0x1eb   :  { %v2046_v50 = vadd.f32 %v2045_v49, %v2033_v48 }
 0x1ed   :  { %v2101_v51 = vmax.f32 %v2046_v50, 0.0 }
 0x1ef   :  { %v2103_v52 = vpack.c.bf16 %v2101_v51, %v2101_v51 }
 0x1f1   :  { %2245 = vmatmul.bf16.vlgmr.msra.gmra.mxu0 %v2103_v52 }
 0x1f2   :  { %v2047_v53 = vpop.f32.mrf.mxu3 }
 0x1fa   :  { %v2097_v55 = vpop.f32.mrf.mxu3 }
 0x1fb   :  { %v2098_v57 = vadd.f32 %v2097_v55, %v2085_v54 }
 0x1fd   :  { %v2102_v58 = vmax.f32 %v2098_v57, 0.0 }
 0x1ff   :  { %v2104_v59 = vpack.c.bf16 %v2102_v58, %v2102_v58 }
 0x201   :  { %2258 = vmatmul.bf16.vlgmr.msra.gmra.mxu1 %v2104_v59 }
 0x202   :  { %v2099_v19 = vpop.f32.mrf.mxu3 }
 0x26e   :  { %v2246_v60 = vpop.f32.mrf.mxu0 }
 0x26f   :  { %v2247_v62 = vadd.f32 %v3655_v22, %v2246_v60 }
 0x276   :  { %v2248_v61 = vpop.f32.mrf.mxu0 }
 0x27e   :  { %v2259_v63 = vpop.f32.mrf.mxu1 }
 0x27f   :  { %v2260_v0 = vadd.f32 %v2259_v63, %v2247_v62 }
 0x281   :  { %2263 = vst [vmem:[#allocation11] sm:$0xff] %v2260_v0 }
 0x282   :  { %2274 = dma.vmem_to_hbm [thread:$0]  %s2270_s8, 128, %s2272_s11, [#allocation4]  }
 0x286   :  { %v2261_v1 = vpop.f32.mrf.mxu1 }
 0x287   :  { %3806 = dma.done.wait [#allocation4], 128  }
 0x288   :  { %3807 = vsyncadd [#allocation4], 4294967168 }
 0x289   :  { %2279 = vsyncpa [#allocation3], 1 }
 0x28a   :  { %2280 = vsyncpa [#allocation6], 1 }
 0x28b   :  { %2281 = vsyncpa [#allocation9], 1 }
 0x28c   :  { %2282 = vsyncpa [#allocation4], 1 }

</bundles_post_ra>
